<compile_context>
chip_gen: v6e
topology: v6e:2x2x1
jax: 0.10.0
libtpu: 0.0.40
codegen_flags: <defaults>
</compile_context>

<pallas_src>
import functools

import numpy as np

import jax
import jax.numpy as jnp
from jax import lax
from jax.experimental import pallas as pl
from jax.experimental.pallas import tpu as pltpu


# ---------------------------------------------------------------------------
# Stage 1: Gaussian blur -> Sobel -> normalised |grad| -> non-max suppression.
# ---------------------------------------------------------------------------
def _canny_thin_edges_kernel(img_ref, thin_ref, padw, padh, pad2,
                             *, H, W, gk, t1, t2):
    ks = len(gk)
    half = ks // 2
    x = img_ref[0]                                    # (H, W) f32

    # --- Gaussian blur: horizontal 1xK then vertical Kx1, zero padded. ---
    padw[...] = jnp.zeros_like(padw)
    padw[:, pl.ds(half, W)] = x
    sm = gk[0] * padw[:, pl.ds(0, W)]
    for i in range(1, ks):
        sm = sm + gk[i] * padw[:, pl.ds(i, W)]

    padh[...] = jnp.zeros_like(padh)
    padh[pl.ds(half, H), :] = sm
    smv = gk[0] * padh[pl.ds(0, H), :]
    for i in range(1, ks):
        smv = smv + gk[i] * padh[pl.ds(i, H), :]

    # --- Sobel gradients (3x3 cross-correlation, zero padded). ---
    pad2[...] = jnp.zeros_like(pad2)
    pad2[pl.ds(1, H), pl.ds(1, W)] = smv

    def nb(dy, dx):
        return pad2[pl.ds(1 + dy, H), pl.ds(1 + dx, W)]

    ix = (nb(-1, -1) - nb(-1, 1) + 2.0 * nb(0, -1) - 2.0 * nb(0, 1)
          + nb(1, -1) - nb(1, 1))
    iy = (nb(-1, -1) + 2.0 * nb(-1, 0) + nb(-1, 1)
          - nb(1, -1) - 2.0 * nb(1, 0) - nb(1, 1))

    gm = jnp.sqrt(ix * ix + iy * iy)
    gmax = jnp.max(jnp.max(gm, axis=1, keepdims=True), axis=0, keepdims=True)
    gm = gm / gmax                                    # per-image max (C == 1)

    # --- Quantised gradient direction index (0..7).  Equivalent to
    #       round((atan2(Iy, Ix) * 180/3.1415926 + 180) / 45) % 8
    #     but computed with sign / slope comparisons (no atan2 on the VPU). ---
    axp = jnp.abs(ix)
    ayp = jnp.abs(iy)
    near_x = ayp <= t1 * axp          # within ~22.5 deg of the x axis
    near_y = ayp >= t2 * axp          # within ~22.5 deg of the y axis
    q = jnp.where(near_x, 0, jnp.where(near_y, 2, 1))
    k = jnp.where(ix >= 0.0,
                  jnp.where(iy >= 0.0, q, -q),
                  jnp.where(iy >= 0.0, 4 - q, q - 4))
    idx = k + 4
    idx = jnp.where(idx == 8, 0, idx)

    # --- Non-max suppression along +/- gradient direction. ---
    pad2[...] = jnp.zeros_like(pad2)
    pad2[pl.ds(1, H), pl.ds(1, W)] = gm
    # neighbour offsets matching directional filters 0,45,...,315 degrees
    offs = ((0, 1), (1, 1), (1, 0), (1, -1), (0, -1), (-1, -1), (-1, 0), (-1, 1))
    pos_nb = jnp.zeros_like(gm)
    neg_nb = jnp.zeros_like(gm)
    for d, (dy, dx) in enumerate(offs):
        v = nb(dy, dx)
        pos_nb = pos_nb + jnp.where(idx == d, v, 0.0)
        neg_nb = neg_nb + jnp.where(idx == ((d + 4) % 8), v, 0.0)
    is_max = jnp.minimum(gm - pos_nb, gm - neg_nb) > 0.0
    thin_ref[0] = jnp.where(is_max, gm, 0.0)


# ---------------------------------------------------------------------------
# Stage 2: double threshold + hysteresis + finalisation.
# ---------------------------------------------------------------------------
def _canny_hysteresis_kernel(thr_ref, thin_ref, out_ref, spad,
                             *, H, W, strong_pixel, low_threshold, n_iters):
    thr = thr_ref[0, 0]                               # scalar from SMEM
    thin = thin_ref[0]                                # (H, W)

    strong = jnp.where(thin >= thr, 1.0, 0.0)
    weak = jnp.logical_and(thin < thr, thin >= low_threshold)

    spad[...] = jnp.zeros_like(spad)
    spad[pl.ds(1, H), pl.ds(1, W)] = strong

    # TODO(synk): fixed-bound loop (H*W steps) reaches the same fixed point as
    # torch's data-dependent while loop; a convergence-checked lax.while_loop
    # would be cheaper for large images with short weak chains.
    def body(step, carry):
        s = jnp.zeros((H, W), jnp.float32)
        for dy in (-1, 0, 1):
            for dx in (-1, 0, 1):
                if dy == 0 and dx == 0:
                    continue
                s = s + spad[pl.ds(1 + dy, H), pl.ds(1 + dx, W)]
        new_strong = jnp.logical_and(weak, s > 0.0)
        cur = spad[pl.ds(1, H), pl.ds(1, W)]
        spad[pl.ds(1, H), pl.ds(1, W)] = jnp.maximum(
            cur, jnp.where(new_strong, 1.0, 0.0))
        return carry

    lax.fori_loop(0, n_iters, body, 0)

    final_strong = spad[pl.ds(1, H), pl.ds(1, W)] > 0.0
    out_ref[0] = jnp.where(final_strong, jnp.float32(strong_pixel), 0.0)


# ---------------------------------------------------------------------------
# Wrapper
# ---------------------------------------------------------------------------
def canny_edge_pallas(img, *, sigma=1.0, kernel_size=5, weak_pixel=75,
                      strong_pixel=255, low_threshold=0.00392,
                      high_threshold=0.15, use_hysteresis=True):
    B, C, H, W = img.shape
    if C != 1:
        raise ValueError("CannyEdge requires a single input channel")
    if not use_hysteresis:
        # TODO(synk): dynamic-shape output of the no-hysteresis branch.
        raise NotImplementedError("use_hysteresis=False is not supported")
    # NOTE: weak_pixel only labels the intermediate map in torch; it never
    # reaches the output when hysteresis is enabled, so it is not needed here.
    del weak_pixel

    x = img.reshape(B, H, W).astype(jnp.float32)

    # scipy.signal.gaussian taps (un-normalised), float32 like the torch module.
    n = np.arange(kernel_size, dtype=np.float64) - (kernel_size - 1) / 2.0
    g = np.exp(-0.5 * (n / float(sigma)) ** 2).astype(np.float32)
    gk = tuple(float(v) for v in g)

    # sector boundaries for the direction quantisation (same pi constant as torch)
    a = 45.0 * 3.1415926 / 180.0
    t1 = float(np.tan(0.5 * a))
    t2 = float(np.tan(1.5 * a))

    stage1 = functools.partial(_canny_thin_edges_kernel,
                               H=H, W=W, gk=gk, t1=t1, t2=t2)
    thin = pl.pallas_call(
        stage1,
        out_shape=jax.ShapeDtypeStruct((B, H, W), jnp.float32),
        grid_spec=pltpu.PrefetchScalarGridSpec(
            num_scalar_prefetch=0,
            grid=(B,),
            in_specs=[pl.BlockSpec((1, H, W), lambda b: (b, 0, 0))],
            out_specs=pl.BlockSpec((1, H, W), lambda b: (b, 0, 0)),
            scratch_shapes=[
                pltpu.VMEM((H, W + kernel_size - 1), jnp.float32),
                pltpu.VMEM((H + kernel_size - 1, W), jnp.float32),
                pltpu.VMEM((H + 2, W + 2), jnp.float32),
            ],
        ),
        compiler_params=pltpu.CompilerParams(
            dimension_semantics=("parallel",)),
    )(x)

    # Batch-global max (tiny reduce) -> high threshold, fed to stage 2 via SMEM.
    high_thr = (jnp.max(thin) * jnp.float32(high_threshold)).reshape(1, 1)
    high_thr = high_thr.astype(jnp.float32)

    stage2 = functools.partial(_canny_hysteresis_kernel,
                               H=H, W=W,
                               strong_pixel=float(strong_pixel),
                               low_threshold=float(low_threshold),
                               n_iters=H * W)
    out = pl.pallas_call(
        stage2,
        out_shape=jax.ShapeDtypeStruct((B, H, W), jnp.float32),
        grid_spec=pltpu.PrefetchScalarGridSpec(
            num_scalar_prefetch=0,
            grid=(B,),
            in_specs=[
                pl.BlockSpec(memory_space=pltpu.MemorySpace.SMEM),
                pl.BlockSpec((1, H, W), lambda b: (b, 0, 0)),
            ],
            out_specs=pl.BlockSpec((1, H, W), lambda b: (b, 0, 0)),
            scratch_shapes=[pltpu.VMEM((H + 2, W + 2), jnp.float32)],
        ),
        compiler_params=pltpu.CompilerParams(
            dimension_semantics=("parallel",)),
    )(high_thr, thin)

    return out.reshape(B, 1, H, W)


# ---------------------------------------------------------------------------
# Pure-JAX reference implementing the torch semantics (atan2-based direction,
# gather-based NMS, convergence-checked hysteresis).
# ---------------------------------------------------------------------------
def canny_edge_ref(img, *, sigma=1.0, kernel_size=5, strong_pixel=255,
                   low_threshold=0.00392, high_threshold=0.15):
    B, C, H, W = img.shape
    x = img.astype(jnp.float32)[:, 0]                 # (B, H, W)

    n = np.arange(kernel_size, dtype=np.float64) - (kernel_size - 1) / 2.0
    g = np.exp(-0.5 * (n / float(sigma)) ** 2).astype(np.float32)
    half = kernel_size // 2

    xp = jnp.pad(x, ((0, 0), (0, 0), (half, half)))
    sm = float(g[0]) * xp[:, :, 0:W]
    for i in range(1, kernel_size):
        sm = sm + float(g[i]) * xp[:, :, i:i + W]
    smp = jnp.pad(sm, ((0, 0), (half, half), (0, 0)))
    sm2 = float(g[0]) * smp[:, 0:H, :]
    for i in range(1, kernel_size):
        sm2 = sm2 + float(g[i]) * smp[:, i:i + H, :]

    p = jnp.pad(sm2, ((0, 0), (1, 1), (1, 1)))

    def nb(dy, dx):
        return p[:, 1 + dy:1 + dy + H, 1 + dx:1 + dx + W]

    ix = (nb(-1, -1) - nb(-1, 1) + 2.0 * nb(0, -1) - 2.0 * nb(0, 1)
          + nb(1, -1) - nb(1, 1))
    iy = (nb(-1, -1) + 2.0 * nb(-1, 0) + nb(-1, 1)
          - nb(1, -1) - 2.0 * nb(1, 0) - nb(1, 1))

    gm = jnp.sqrt(ix * ix + iy * iy)
    gm = gm / jnp.max(gm.reshape(B, -1), axis=1).reshape(B, 1, 1)

    gd = jnp.arctan2(iy, ix) * (180.0 / 3.1415926) + 180.0
    gd = jnp.round(gd / 45.0) * 45.0
    idx_pos = (gd / 45.0).astype(jnp.int32) % 8
    idx_neg = (idx_pos + 4) % 8

    pg = jnp.pad(gm, ((0, 0), (1, 1), (1, 1)))

    def nbg(dy, dx):
        return pg[:, 1 + dy:1 + dy + H, 1 + dx:1 + dx + W]

    offs = ((0, 1), (1, 1), (1, 0), (1, -1), (0, -1), (-1, -1), (-1, 0), (-1, 1))
    neigh = jnp.stack([nbg(dy, dx) for dy, dx in offs], axis=1)   # (B,8,H,W)
    pos_n = jnp.take_along_axis(neigh, idx_pos[:, None], axis=1)[:, 0]
    neg_n = jnp.take_along_axis(neigh, idx_neg[:, None], axis=1)[:, 0]
    is_max = jnp.minimum(gm - pos_n, gm - neg_n) > 0.0
    thin = jnp.where(is_max, gm, 0.0)

    high_thr = jnp.max(thin) * jnp.float32(high_threshold)
    strong = thin >= high_thr
    weak = jnp.logical_and(thin < high_thr, thin >= low_threshold)

    def dilate(s):
        sp = jnp.pad(s.astype(jnp.float32), ((0, 0), (1, 1), (1, 1)))
        tot = jnp.zeros_like(thin)
        for dy in (-1, 0, 1):
            for dx in (-1, 0, 1):
                if dy == 0 and dx == 0:
                    continue
                tot = tot + sp[:, 1 + dy:1 + dy + H, 1 + dx:1 + dx + W]
        return tot > 0.0

    def cond(state):
        return state[1]

    def body(state):
        s, _ = state
        s2 = jnp.logical_or(s, jnp.logical_and(weak, dilate(s)))
        return s2, jnp.any(s2 != s)

    strong_fp, _ = lax.while_loop(cond, body, (strong, jnp.array(True)))
    out = jnp.where(strong_fp, jnp.float32(strong_pixel), 0.0)
    return out.reshape(B, 1, H, W)


if __name__ == "__main__":
    key = jax.random.PRNGKey(0)
    B, C, H, W = 2, 1, 16, 16
    img = jax.random.uniform(key, (B, C, H, W), jnp.float32)

    out = jax.block_until_ready(jax.jit(canny_edge_pallas)(img))
    ref = jax.block_until_ready(canny_edge_ref(img))

    assert out.shape == (B, 1, H, W) and out.dtype == jnp.float32
    assert bool(jnp.array_equal(out, ref)), (out, ref)
    print("KERNEL_OK")
</pallas_src>

<mosaic_0001>
module attributes {stable_mosaic.version = 11 : i64} {
  func.func @_canny_hysteresis_kernel(%arg0: i32, %arg1: memref<1x1xf32, #tpu.memory_space<smem>>, %arg2: memref<1x16x16xf32, #tpu.memory_space<vmem>>, %arg3: memref<1x16x16xf32, #tpu.memory_space<vmem>>, %arg4: memref<18x18xf32, #tpu.memory_space<vmem>>) attributes {dimension_semantics = [#tpu.dimension_semantics<parallel>], iteration_bounds = array<i64: 2>, scalar_prefetch = 0 : i64, scratch_operands = 1 : i64, tpu.core_type = #tpu.core_type<tc>, window_params = [{transform_indices = @transform_0, window_bounds = array<i64: 1, 1>}, {transform_indices = @transform_1, window_bounds = array<i64: 1, 16, 16>}, {transform_indices = @transform_2, window_bounds = array<i64: 1, 16, 16>}]} {
    %c0 = arith.constant 0 : index
    %c0_0 = arith.constant 0 : index
    %0 = memref.load %arg1[%c0, %c0_0] : memref<1x1xf32, #tpu.memory_space<smem>>
    %c0_1 = arith.constant 0 : index
    %c0_2 = arith.constant 0 : index
    %c0_3 = arith.constant 0 : index
    %1 = vector.load %arg2[%c0_1, %c0_2, %c0_3] : memref<1x16x16xf32, #tpu.memory_space<vmem>>, vector<1x16x16xf32>
    %2 = vector.shape_cast %1 : vector<1x16x16xf32> to vector<16x16xf32>
    %3 = vector.broadcast %0 : f32 to vector<16x16xf32>
    %4 = arith.cmpf oge, %2, %3 : vector<16x16xf32>
    %cst = arith.constant 1.000000e+00 : f32
    %cst_4 = arith.constant 0.000000e+00 : f32
    %5 = vector.broadcast %cst : f32 to vector<16x16xf32>
    %6 = vector.broadcast %cst_4 : f32 to vector<16x16xf32>
    %7 = arith.select %4, %5, %6 : vector<16x16xi1>, vector<16x16xf32>
    %8 = vector.broadcast %0 : f32 to vector<16x16xf32>
    %9 = arith.cmpf olt, %2, %8 : vector<16x16xf32>
    %cst_5 = arith.constant 3.920000e-03 : f32
    %10 = vector.broadcast %cst_5 : f32 to vector<16x16xf32>
    %11 = arith.cmpf oge, %2, %10 : vector<16x16xf32>
    %12 = arith.andi %9, %11 : vector<16x16xi1>
    %cst_6 = arith.constant 0.000000e+00 : f32
    %13 = vector.broadcast %cst_6 : f32 to vector<18x18xf32>
    %c0_7 = arith.constant 0 : index
    %c0_8 = arith.constant 0 : index
    %14 = vector.load %arg4[%c0_7, %c0_8] : memref<18x18xf32, #tpu.memory_space<vmem>>, vector<18x18xf32>
    tpu.vector_store %arg4[%c0_7, %c0_8], %13 {strides = array<i32>} : memref<18x18xf32, #tpu.memory_space<vmem>>, vector<18x18xf32>,
    %c1 = arith.constant 1 : index
    %c1_9 = arith.constant 1 : index
    %15 = vector.load %arg4[%c1, %c1_9] : memref<18x18xf32, #tpu.memory_space<vmem>>, vector<16x16xf32>
    tpu.vector_store %arg4[%c1, %c1_9], %7 {strides = array<i32>} : memref<18x18xf32, #tpu.memory_space<vmem>>, vector<16x16xf32>,
    %c0_i32 = arith.constant 0 : i32
    %c256_i32 = arith.constant 256 : i32
    %16 = arith.addi %c0_i32, %c256_i32 : i32
    %c1_i32 = arith.constant 1 : i32
    scf.for %arg5 = %c0_i32 to %16 step %c1_i32  : i32 {
      %cst_18 = arith.constant 0.000000e+00 : f32
      %26 = vector.broadcast %cst_18 : f32 to vector<16x16xf32>
      %c0_19 = arith.constant 0 : index
      %c0_20 = arith.constant 0 : index
      %27 = vector.load %arg4[%c0_19, %c0_20] : memref<18x18xf32, #tpu.memory_space<vmem>>, vector<16x16xf32>
      %28 = arith.addf %26, %27 : vector<16x16xf32>
      %c0_21 = arith.constant 0 : index
      %c1_22 = arith.constant 1 : index
      %29 = vector.load %arg4[%c0_21, %c1_22] : memref<18x18xf32, #tpu.memory_space<vmem>>, vector<16x16xf32>
      %30 = arith.addf %28, %29 : vector<16x16xf32>
      %c0_23 = arith.constant 0 : index
      %c2 = arith.constant 2 : index
      %31 = vector.load %arg4[%c0_23, %c2] : memref<18x18xf32, #tpu.memory_space<vmem>>, vector<16x16xf32>
      %32 = arith.addf %30, %31 : vector<16x16xf32>
      %c1_24 = arith.constant 1 : index
      %c0_25 = arith.constant 0 : index
      %33 = vector.load %arg4[%c1_24, %c0_25] : memref<18x18xf32, #tpu.memory_space<vmem>>, vector<16x16xf32>
      %34 = arith.addf %32, %33 : vector<16x16xf32>
      %c1_26 = arith.constant 1 : index
      %c2_27 = arith.constant 2 : index
      %35 = vector.load %arg4[%c1_26, %c2_27] : memref<18x18xf32, #tpu.memory_space<vmem>>, vector<16x16xf32>
      %36 = arith.addf %34, %35 : vector<16x16xf32>
      %c2_28 = arith.constant 2 : index
      %c0_29 = arith.constant 0 : index
      %37 = vector.load %arg4[%c2_28, %c0_29] : memref<18x18xf32, #tpu.memory_space<vmem>>, vector<16x16xf32>
      %38 = arith.addf %36, %37 : vector<16x16xf32>
      %c2_30 = arith.constant 2 : index
      %c1_31 = arith.constant 1 : index
      %39 = vector.load %arg4[%c2_30, %c1_31] : memref<18x18xf32, #tpu.memory_space<vmem>>, vector<16x16xf32>
      %40 = arith.addf %38, %39 : vector<16x16xf32>
      %c2_32 = arith.constant 2 : index
      %c2_33 = arith.constant 2 : index
      %41 = vector.load %arg4[%c2_32, %c2_33] : memref<18x18xf32, #tpu.memory_space<vmem>>, vector<16x16xf32>
      %42 = arith.addf %40, %41 : vector<16x16xf32>
      %cst_34 = arith.constant 0.000000e+00 : f32
      %43 = vector.broadcast %cst_34 : f32 to vector<16x16xf32>
      %44 = arith.cmpf ogt, %42, %43 : vector<16x16xf32>
      %45 = arith.andi %12, %44 : vector<16x16xi1>
      %c1_35 = arith.constant 1 : index
      %c1_36 = arith.constant 1 : index
      %46 = vector.load %arg4[%c1_35, %c1_36] : memref<18x18xf32, #tpu.memory_space<vmem>>, vector<16x16xf32>
      %cst_37 = arith.constant 1.000000e+00 : f32
      %cst_38 = arith.constant 0.000000e+00 : f32
      %47 = vector.broadcast %cst_37 : f32 to vector<16x16xf32>
      %48 = vector.broadcast %cst_38 : f32 to vector<16x16xf32>
      %49 = arith.select %45, %47, %48 : vector<16x16xi1>, vector<16x16xf32>
      %50 = arith.maximumf %46, %49 : vector<16x16xf32>
      %c1_39 = arith.constant 1 : index
      %c1_40 = arith.constant 1 : index
      %51 = vector.load %arg4[%c1_39, %c1_40] : memref<18x18xf32, #tpu.memory_space<vmem>>, vector<16x16xf32>
      tpu.vector_store %arg4[%c1_39, %c1_40], %50 {strides = array<i32>} : memref<18x18xf32, #tpu.memory_space<vmem>>, vector<16x16xf32>,
    }
    %c1_10 = arith.constant 1 : index
    %c1_11 = arith.constant 1 : index
    %17 = vector.load %arg4[%c1_10, %c1_11] : memref<18x18xf32, #tpu.memory_space<vmem>>, vector<16x16xf32>
    %cst_12 = arith.constant 0.000000e+00 : f32
    %18 = vector.broadcast %cst_12 : f32 to vector<16x16xf32>
    %19 = arith.cmpf ogt, %17, %18 : vector<16x16xf32>
    %cst_13 = arith.constant 2.550000e+02 : f32
    %cst_14 = arith.constant 0.000000e+00 : f32
    %20 = vector.broadcast %cst_13 : f32 to vector<16x16xf32>
    %21 = vector.broadcast %cst_14 : f32 to vector<16x16xf32>
    %22 = arith.select %19, %20, %21 : vector<16x16xi1>, vector<16x16xf32>
    %c0_15 = arith.constant 0 : index
    %c0_16 = arith.constant 0 : index
    %c0_17 = arith.constant 0 : index
    %23 = vector.load %arg3[%c0_15, %c0_16, %c0_17] : memref<1x16x16xf32, #tpu.memory_space<vmem>>, vector<1x16x16xf32>
    %24 = vector.shape_cast %23 : vector<1x16x16xf32> to vector<16x16xf32>
    %25 = vector.shape_cast %22 : vector<16x16xf32> to vector<1x16x16xf32>
    tpu.vector_store %arg3[%c0_15, %c0_16, %c0_17], %25 {strides = array<i32>} : memref<1x16x16xf32, #tpu.memory_space<vmem>>, vector<1x16x16xf32>,
    return
  }
  func.func @transform_0(%arg0: i32) -> (i32, i32) {
    %c0_i32 = arith.constant 0 : i32
    %c0_i32_0 = arith.constant 0 : i32
    %c0_i32_1 = arith.constant 0 : i32
    return %c0_i32, %c0_i32_0 : i32, i32
  }
  func.func @transform_1(%arg0: i32) -> (i32, i32, i32) {
    %c0_i32 = arith.constant 0 : i32
    %c0_i32_0 = arith.constant 0 : i32
    %c0_i32_1 = arith.constant 0 : i32
    return %arg0, %c0_i32, %c0_i32_0 : i32, i32, i32
  }
  func.func @transform_2(%arg0: i32) -> (i32, i32, i32) {
    %c0_i32 = arith.constant 0 : i32
    %c0_i32_0 = arith.constant 0 : i32
    %c0_i32_1 = arith.constant 0 : i32
    return %arg0, %c0_i32, %c0_i32_0 : i32, i32, i32
  }
}

module attributes {stable_mosaic.version = 11 : i64} {
  func.func @_canny_thin_edges_kernel(%arg0: i32, %arg1: memref<1x16x16xf32, #tpu.memory_space<vmem>>, %arg2: memref<1x16x16xf32, #tpu.memory_space<vmem>>, %arg3: memref<16x20xf32, #tpu.memory_space<vmem>>, %arg4: memref<20x16xf32, #tpu.memory_space<vmem>>, %arg5: memref<18x18xf32, #tpu.memory_space<vmem>>) attributes {dimension_semantics = [#tpu.dimension_semantics<parallel>], iteration_bounds = array<i64: 2>, scalar_prefetch = 0 : i64, scratch_operands = 3 : i64, tpu.core_type = #tpu.core_type<tc>, window_params = [{transform_indices = @transform_0, window_bounds = array<i64: 1, 16, 16>}, {transform_indices = @transform_1, window_bounds = array<i64: 1, 16, 16>}]} {
    %c0 = arith.constant 0 : index
    %c0_0 = arith.constant 0 : index
    %c0_1 = arith.constant 0 : index
    %0 = vector.load %arg1[%c0, %c0_0, %c0_1] : memref<1x16x16xf32, #tpu.memory_space<vmem>>, vector<1x16x16xf32>
    %1 = vector.shape_cast %0 : vector<1x16x16xf32> to vector<16x16xf32>
    %cst = arith.constant 0.000000e+00 : f32
    %2 = vector.broadcast %cst : f32 to vector<16x20xf32>
    %c0_2 = arith.constant 0 : index
    %c0_3 = arith.constant 0 : index
    %3 = vector.load %arg3[%c0_2, %c0_3] : memref<16x20xf32, #tpu.memory_space<vmem>>, vector<16x20xf32>
    tpu.vector_store %arg3[%c0_2, %c0_3], %2 {strides = array<i32>} : memref<16x20xf32, #tpu.memory_space<vmem>>, vector<16x20xf32>,
    %c0_4 = arith.constant 0 : index
    %c2 = arith.constant 2 : index
    %4 = vector.load %arg3[%c0_4, %c2] : memref<16x20xf32, #tpu.memory_space<vmem>>, vector<16x16xf32>
    tpu.vector_store %arg3[%c0_4, %c2], %1 {strides = array<i32>} : memref<16x20xf32, #tpu.memory_space<vmem>>, vector<16x16xf32>,
    %c0_5 = arith.constant 0 : index
    %c0_6 = arith.constant 0 : index
    %5 = vector.load %arg3[%c0_5, %c0_6] : memref<16x20xf32, #tpu.memory_space<vmem>>, vector<16x16xf32>
    %cst_7 = arith.constant 0.135335281 : f32
    %6 = vector.broadcast %cst_7 : f32 to vector<16x16xf32>
    %7 = arith.mulf %6, %5 : vector<16x16xf32>
    %c0_8 = arith.constant 0 : index
    %c1 = arith.constant 1 : index
    %8 = vector.load %arg3[%c0_8, %c1] : memref<16x20xf32, #tpu.memory_space<vmem>>, vector<16x16xf32>
    %cst_9 = arith.constant 0.606530666 : f32
    %9 = vector.broadcast %cst_9 : f32 to vector<16x16xf32>
    %10 = arith.mulf %9, %8 : vector<16x16xf32>
    %11 = arith.addf %7, %10 : vector<16x16xf32>
    %c0_10 = arith.constant 0 : index
    %c2_11 = arith.constant 2 : index
    %12 = vector.load %arg3[%c0_10, %c2_11] : memref<16x20xf32, #tpu.memory_space<vmem>>, vector<16x16xf32>
    %cst_12 = arith.constant 1.000000e+00 : f32
    %13 = vector.broadcast %cst_12 : f32 to vector<16x16xf32>
    %14 = arith.mulf %13, %12 : vector<16x16xf32>
    %15 = arith.addf %11, %14 : vector<16x16xf32>
    %c0_13 = arith.constant 0 : index
    %c3 = arith.constant 3 : index
    %16 = vector.load %arg3[%c0_13, %c3] : memref<16x20xf32, #tpu.memory_space<vmem>>, vector<16x16xf32>
    %cst_14 = arith.constant 0.606530666 : f32
    %17 = vector.broadcast %cst_14 : f32 to vector<16x16xf32>
    %18 = arith.mulf %17, %16 : vector<16x16xf32>
    %19 = arith.addf %15, %18 : vector<16x16xf32>
    %c0_15 = arith.constant 0 : index
    %c4 = arith.constant 4 : index
    %20 = vector.load %arg3[%c0_15, %c4] : memref<16x20xf32, #tpu.memory_space<vmem>>, vector<16x16xf32>
    %cst_16 = arith.constant 0.135335281 : f32
    %21 = vector.broadcast %cst_16 : f32 to vector<16x16xf32>
    %22 = arith.mulf %21, %20 : vector<16x16xf32>
    %23 = arith.addf %19, %22 : vector<16x16xf32>
    %cst_17 = arith.constant 0.000000e+00 : f32
    %24 = vector.broadcast %cst_17 : f32 to vector<20x16xf32>
    %c0_18 = arith.constant 0 : index
    %c0_19 = arith.constant 0 : index
    %25 = vector.load %arg4[%c0_18, %c0_19] : memref<20x16xf32, #tpu.memory_space<vmem>>, vector<20x16xf32>
    tpu.vector_store %arg4[%c0_18, %c0_19], %24 {strides = array<i32>} : memref<20x16xf32, #tpu.memory_space<vmem>>, vector<20x16xf32>,
    %c2_20 = arith.constant 2 : index
    %c0_21 = arith.constant 0 : index
    %26 = vector.load %arg4[%c2_20, %c0_21] : memref<20x16xf32, #tpu.memory_space<vmem>>, vector<16x16xf32>
    tpu.vector_store %arg4[%c2_20, %c0_21], %23 {strides = array<i32>} : memref<20x16xf32, #tpu.memory_space<vmem>>, vector<16x16xf32>,
    %c0_22 = arith.constant 0 : index
    %c0_23 = arith.constant 0 : index
    %27 = vector.load %arg4[%c0_22, %c0_23] : memref<20x16xf32, #tpu.memory_space<vmem>>, vector<16x16xf32>
    %cst_24 = arith.constant 0.135335281 : f32
    %28 = vector.broadcast %cst_24 : f32 to vector<16x16xf32>
    %29 = arith.mulf %28, %27 : vector<16x16xf32>
    %c1_25 = arith.constant 1 : index
    %c0_26 = arith.constant 0 : index
    %30 = vector.load %arg4[%c1_25, %c0_26] : memref<20x16xf32, #tpu.memory_space<vmem>>, vector<16x16xf32>
    %cst_27 = arith.constant 0.606530666 : f32
    %31 = vector.broadcast %cst_27 : f32 to vector<16x16xf32>
    %32 = arith.mulf %31, %30 : vector<16x16xf32>
    %33 = arith.addf %29, %32 : vector<16x16xf32>
    %c2_28 = arith.constant 2 : index
    %c0_29 = arith.constant 0 : index
    %34 = vector.load %arg4[%c2_28, %c0_29] : memref<20x16xf32, #tpu.memory_space<vmem>>, vector<16x16xf32>
    %cst_30 = arith.constant 1.000000e+00 : f32
    %35 = vector.broadcast %cst_30 : f32 to vector<16x16xf32>
    %36 = arith.mulf %35, %34 : vector<16x16xf32>
    %37 = arith.addf %33, %36 : vector<16x16xf32>
    %c3_31 = arith.constant 3 : index
    %c0_32 = arith.constant 0 : index
    %38 = vector.load %arg4[%c3_31, %c0_32] : memref<20x16xf32, #tpu.memory_space<vmem>>, vector<16x16xf32>
    %cst_33 = arith.constant 0.606530666 : f32
    %39 = vector.broadcast %cst_33 : f32 to vector<16x16xf32>
    %40 = arith.mulf %39, %38 : vector<16x16xf32>
    %41 = arith.addf %37, %40 : vector<16x16xf32>
    %c4_34 = arith.constant 4 : index
    %c0_35 = arith.constant 0 : index
    %42 = vector.load %arg4[%c4_34, %c0_35] : memref<20x16xf32, #tpu.memory_space<vmem>>, vector<16x16xf32>
    %cst_36 = arith.constant 0.135335281 : f32
    %43 = vector.broadcast %cst_36 : f32 to vector<16x16xf32>
    %44 = arith.mulf %43, %42 : vector<16x16xf32>
    %45 = arith.addf %41, %44 : vector<16x16xf32>
    %cst_37 = arith.constant 0.000000e+00 : f32
    %46 = vector.broadcast %cst_37 : f32 to vector<18x18xf32>
    %c0_38 = arith.constant 0 : index
    %c0_39 = arith.constant 0 : index
    %47 = vector.load %arg5[%c0_38, %c0_39] : memref<18x18xf32, #tpu.memory_space<vmem>>, vector<18x18xf32>
    tpu.vector_store %arg5[%c0_38, %c0_39], %46 {strides = array<i32>} : memref<18x18xf32, #tpu.memory_space<vmem>>, vector<18x18xf32>,
    %c1_40 = arith.constant 1 : index
    %c1_41 = arith.constant 1 : index
    %48 = vector.load %arg5[%c1_40, %c1_41] : memref<18x18xf32, #tpu.memory_space<vmem>>, vector<16x16xf32>
    tpu.vector_store %arg5[%c1_40, %c1_41], %45 {strides = array<i32>} : memref<18x18xf32, #tpu.memory_space<vmem>>, vector<16x16xf32>,
    %c0_42 = arith.constant 0 : index
    %c0_43 = arith.constant 0 : index
    %49 = vector.load %arg5[%c0_42, %c0_43] : memref<18x18xf32, #tpu.memory_space<vmem>>, vector<16x16xf32>
    %c0_44 = arith.constant 0 : index
    %c2_45 = arith.constant 2 : index
    %50 = vector.load %arg5[%c0_44, %c2_45] : memref<18x18xf32, #tpu.memory_space<vmem>>, vector<16x16xf32>
    %51 = arith.subf %49, %50 : vector<16x16xf32>
    %c1_46 = arith.constant 1 : index
    %c0_47 = arith.constant 0 : index
    %52 = vector.load %arg5[%c1_46, %c0_47] : memref<18x18xf32, #tpu.memory_space<vmem>>, vector<16x16xf32>
    %cst_48 = arith.constant 2.000000e+00 : f32
    %53 = vector.broadcast %cst_48 : f32 to vector<16x16xf32>
    %54 = arith.mulf %53, %52 : vector<16x16xf32>
    %55 = arith.addf %51, %54 : vector<16x16xf32>
    %c1_49 = arith.constant 1 : index
    %c2_50 = arith.constant 2 : index
    %56 = vector.load %arg5[%c1_49, %c2_50] : memref<18x18xf32, #tpu.memory_space<vmem>>, vector<16x16xf32>
    %cst_51 = arith.constant 2.000000e+00 : f32
    %57 = vector.broadcast %cst_51 : f32 to vector<16x16xf32>
    %58 = arith.mulf %57, %56 : vector<16x16xf32>
    %59 = arith.subf %55, %58 : vector<16x16xf32>
    %c2_52 = arith.constant 2 : index
    %c0_53 = arith.constant 0 : index
    %60 = vector.load %arg5[%c2_52, %c0_53] : memref<18x18xf32, #tpu.memory_space<vmem>>, vector<16x16xf32>
    %61 = arith.addf %59, %60 : vector<16x16xf32>
    %c2_54 = arith.constant 2 : index
    %c2_55 = arith.constant 2 : index
    %62 = vector.load %arg5[%c2_54, %c2_55] : memref<18x18xf32, #tpu.memory_space<vmem>>, vector<16x16xf32>
    %63 = arith.subf %61, %62 : vector<16x16xf32>
    %c0_56 = arith.constant 0 : index
    %c0_57 = arith.constant 0 : index
    %64 = vector.load %arg5[%c0_56, %c0_57] : memref<18x18xf32, #tpu.memory_space<vmem>>, vector<16x16xf32>
    %c0_58 = arith.constant 0 : index
    %c1_59 = arith.constant 1 : index
    %65 = vector.load %arg5[%c0_58, %c1_59] : memref<18x18xf32, #tpu.memory_space<vmem>>, vector<16x16xf32>
    %cst_60 = arith.constant 2.000000e+00 : f32
    %66 = vector.broadcast %cst_60 : f32 to vector<16x16xf32>
    %67 = arith.mulf %66, %65 : vector<16x16xf32>
    %68 = arith.addf %64, %67 : vector<16x16xf32>
    %c0_61 = arith.constant 0 : index
    %c2_62 = arith.constant 2 : index
    %69 = vector.load %arg5[%c0_61, %c2_62] : memref<18x18xf32, #tpu.memory_space<vmem>>, vector<16x16xf32>
    %70 = arith.addf %68, %69 : vector<16x16xf32>
    %c2_63 = arith.constant 2 : index
    %c0_64 = arith.constant 0 : index
    %71 = vector.load %arg5[%c2_63, %c0_64] : memref<18x18xf32, #tpu.memory_space<vmem>>, vector<16x16xf32>
    %72 = arith.subf %70, %71 : vector<16x16xf32>
    %c2_65 = arith.constant 2 : index
    %c1_66 = arith.constant 1 : index
    %73 = vector.load %arg5[%c2_65, %c1_66] : memref<18x18xf32, #tpu.memory_space<vmem>>, vector<16x16xf32>
    %cst_67 = arith.constant 2.000000e+00 : f32
    %74 = vector.broadcast %cst_67 : f32 to vector<16x16xf32>
    %75 = arith.mulf %74, %73 : vector<16x16xf32>
    %76 = arith.subf %72, %75 : vector<16x16xf32>
    %c2_68 = arith.constant 2 : index
    %c2_69 = arith.constant 2 : index
    %77 = vector.load %arg5[%c2_68, %c2_69] : memref<18x18xf32, #tpu.memory_space<vmem>>, vector<16x16xf32>
    %78 = arith.subf %76, %77 : vector<16x16xf32>
    %79 = arith.mulf %63, %63 : vector<16x16xf32>
    %80 = arith.mulf %78, %78 : vector<16x16xf32>
    %81 = arith.addf %79, %80 : vector<16x16xf32>
    %82 = math.sqrt %81 : vector<16x16xf32>
    %cst_70 = arith.constant dense<0xFF800000> : vector<16xf32>
    %83 = vector.multi_reduction <maximumf>, %82, %cst_70 [1] : vector<16x16xf32> to vector<16xf32>
    %84 = vector.shape_cast %83 : vector<16xf32> to vector<16x1xf32>
    %cst_71 = arith.constant dense<0xFF800000> : vector<1xf32>
    %85 = vector.multi_reduction <maximumf>, %84, %cst_71 [0] : vector<16x1xf32> to vector<1xf32>
    %86 = vector.shape_cast %85 : vector<1xf32> to vector<1x1xf32>
    %87 = vector.broadcast %86 : vector<1x1xf32> to vector<16x16xf32>
    %88 = arith.divf %82, %87 : vector<16x16xf32>
    %89 = math.absf %63 : vector<16x16xf32>
    %90 = math.absf %78 : vector<16x16xf32>
    %cst_72 = arith.constant 0.414213568 : f32
    %91 = vector.broadcast %cst_72 : f32 to vector<16x16xf32>
    %92 = arith.mulf %91, %89 : vector<16x16xf32>
    %93 = arith.cmpf ole, %90, %92 : vector<16x16xf32>
    %cst_73 = arith.constant 2.41421342 : f32
    %94 = vector.broadcast %cst_73 : f32 to vector<16x16xf32>
    %95 = arith.mulf %94, %89 : vector<16x16xf32>
    %96 = arith.cmpf oge, %90, %95 : vector<16x16xf32>
    %c2_i32 = arith.constant 2 : i32
    %c1_i32 = arith.constant 1 : i32
    %97 = vector.broadcast %c2_i32 : i32 to vector<16x16xi32>
    %98 = vector.broadcast %c1_i32 : i32 to vector<16x16xi32>
    %99 = arith.select %96, %97, %98 : vector<16x16xi1>, vector<16x16xi32>
    %c0_i32 = arith.constant 0 : i32
    %100 = vector.broadcast %c0_i32 : i32 to vector<16x16xi32>
    %101 = arith.select %93, %100, %99 : vector<16x16xi1>, vector<16x16xi32>
    %cst_74 = arith.constant 0.000000e+00 : f32
    %102 = vector.broadcast %cst_74 : f32 to vector<16x16xf32>
    %103 = arith.cmpf oge, %63, %102 : vector<16x16xf32>
    %cst_75 = arith.constant 0.000000e+00 : f32
    %104 = vector.broadcast %cst_75 : f32 to vector<16x16xf32>
    %105 = arith.cmpf oge, %78, %104 : vector<16x16xf32>
    %c0_i32_76 = arith.constant 0 : i32
    %106 = vector.broadcast %c0_i32_76 : i32 to vector<16x16xi32>
    %107 = arith.subi %106, %101 : vector<16x16xi32>
    %108 = arith.select %105, %101, %107 : vector<16x16xi1>, vector<16x16xi32>
    %cst_77 = arith.constant 0.000000e+00 : f32
    %109 = vector.broadcast %cst_77 : f32 to vector<16x16xf32>
    %110 = arith.cmpf oge, %78, %109 : vector<16x16xf32>
    %c4_i32 = arith.constant 4 : i32
    %111 = vector.broadcast %c4_i32 : i32 to vector<16x16xi32>
    %112 = arith.subi %111, %101 : vector<16x16xi32>
    %c4_i32_78 = arith.constant 4 : i32
    %113 = vector.broadcast %c4_i32_78 : i32 to vector<16x16xi32>
    %114 = arith.subi %101, %113 : vector<16x16xi32>
    %115 = arith.select %110, %112, %114 : vector<16x16xi1>, vector<16x16xi32>
    %116 = arith.select %103, %108, %115 : vector<16x16xi1>, vector<16x16xi32>
    %c4_i32_79 = arith.constant 4 : i32
    %117 = vector.broadcast %c4_i32_79 : i32 to vector<16x16xi32>
    %118 = arith.addi %116, %117 : vector<16x16xi32>
    %c8_i32 = arith.constant 8 : i32
    %119 = vector.broadcast %c8_i32 : i32 to vector<16x16xi32>
    %120 = arith.cmpi eq, %118, %119 : vector<16x16xi32>
    %c0_i32_80 = arith.constant 0 : i32
    %121 = vector.broadcast %c0_i32_80 : i32 to vector<16x16xi32>
    %122 = arith.select %120, %121, %118 : vector<16x16xi1>, vector<16x16xi32>
    %cst_81 = arith.constant 0.000000e+00 : f32
    %123 = vector.broadcast %cst_81 : f32 to vector<18x18xf32>
    %c0_82 = arith.constant 0 : index
    %c0_83 = arith.constant 0 : index
    %124 = vector.load %arg5[%c0_82, %c0_83] : memref<18x18xf32, #tpu.memory_space<vmem>>, vector<18x18xf32>
    tpu.vector_store %arg5[%c0_82, %c0_83], %123 {strides = array<i32>} : memref<18x18xf32, #tpu.memory_space<vmem>>, vector<18x18xf32>,
    %c1_84 = arith.constant 1 : index
    %c1_85 = arith.constant 1 : index
    %125 = vector.load %arg5[%c1_84, %c1_85] : memref<18x18xf32, #tpu.memory_space<vmem>>, vector<16x16xf32>
    tpu.vector_store %arg5[%c1_84, %c1_85], %88 {strides = array<i32>} : memref<18x18xf32, #tpu.memory_space<vmem>>, vector<16x16xf32>,
    %cst_86 = arith.constant 0.000000e+00 : f32
    %126 = vector.broadcast %cst_86 : f32 to vector<16x16xf32>
    %cst_87 = arith.constant 0.000000e+00 : f32
    %127 = vector.broadcast %cst_87 : f32 to vector<16x16xf32>
    %c1_88 = arith.constant 1 : index
    %c2_89 = arith.constant 2 : index
    %128 = vector.load %arg5[%c1_88, %c2_89] : memref<18x18xf32, #tpu.memory_space<vmem>>, vector<16x16xf32>
    %c0_i32_90 = arith.constant 0 : i32
    %129 = vector.broadcast %c0_i32_90 : i32 to vector<16x16xi32>
    %130 = arith.cmpi eq, %122, %129 : vector<16x16xi32>
    %cst_91 = arith.constant 0.000000e+00 : f32
    %131 = vector.broadcast %cst_91 : f32 to vector<16x16xf32>
    %132 = arith.select %130, %128, %131 : vector<16x16xi1>, vector<16x16xf32>
    %133 = arith.addf %126, %132 : vector<16x16xf32>
    %c4_i32_92 = arith.constant 4 : i32
    %134 = vector.broadcast %c4_i32_92 : i32 to vector<16x16xi32>
    %135 = arith.cmpi eq, %122, %134 : vector<16x16xi32>
    %cst_93 = arith.constant 0.000000e+00 : f32
    %136 = vector.broadcast %cst_93 : f32 to vector<16x16xf32>
    %137 = arith.select %135, %128, %136 : vector<16x16xi1>, vector<16x16xf32>
    %138 = arith.addf %127, %137 : vector<16x16xf32>
    %c2_94 = arith.constant 2 : index
    %c2_95 = arith.constant 2 : index
    %139 = vector.load %arg5[%c2_94, %c2_95] : memref<18x18xf32, #tpu.memory_space<vmem>>, vector<16x16xf32>
    %c1_i32_96 = arith.constant 1 : i32
    %140 = vector.broadcast %c1_i32_96 : i32 to vector<16x16xi32>
    %141 = arith.cmpi eq, %122, %140 : vector<16x16xi32>
    %cst_97 = arith.constant 0.000000e+00 : f32
    %142 = vector.broadcast %cst_97 : f32 to vector<16x16xf32>
    %143 = arith.select %141, %139, %142 : vector<16x16xi1>, vector<16x16xf32>
    %144 = arith.addf %133, %143 : vector<16x16xf32>
    %c5_i32 = arith.constant 5 : i32
    %145 = vector.broadcast %c5_i32 : i32 to vector<16x16xi32>
    %146 = arith.cmpi eq, %122, %145 : vector<16x16xi32>
    %cst_98 = arith.constant 0.000000e+00 : f32
    %147 = vector.broadcast %cst_98 : f32 to vector<16x16xf32>
    %148 = arith.select %146, %139, %147 : vector<16x16xi1>, vector<16x16xf32>
    %149 = arith.addf %138, %148 : vector<16x16xf32>
    %c2_99 = arith.constant 2 : index
    %c1_100 = arith.constant 1 : index
    %150 = vector.load %arg5[%c2_99, %c1_100] : memref<18x18xf32, #tpu.memory_space<vmem>>, vector<16x16xf32>
    %c2_i32_101 = arith.constant 2 : i32
    %151 = vector.broadcast %c2_i32_101 : i32 to vector<16x16xi32>
    %152 = arith.cmpi eq, %122, %151 : vector<16x16xi32>
    %cst_102 = arith.constant 0.000000e+00 : f32
    %153 = vector.broadcast %cst_102 : f32 to vector<16x16xf32>
    %154 = arith.select %152, %150, %153 : vector<16x16xi1>, vector<16x16xf32>
    %155 = arith.addf %144, %154 : vector<16x16xf32>
    %c6_i32 = arith.constant 6 : i32
    %156 = vector.broadcast %c6_i32 : i32 to vector<16x16xi32>
    %157 = arith.cmpi eq, %122, %156 : vector<16x16xi32>
    %cst_103 = arith.constant 0.000000e+00 : f32
    %158 = vector.broadcast %cst_103 : f32 to vector<16x16xf32>
    %159 = arith.select %157, %150, %158 : vector<16x16xi1>, vector<16x16xf32>
    %160 = arith.addf %149, %159 : vector<16x16xf32>
    %c2_104 = arith.constant 2 : index
    %c0_105 = arith.constant 0 : index
    %161 = vector.load %arg5[%c2_104, %c0_105] : memref<18x18xf32, #tpu.memory_space<vmem>>, vector<16x16xf32>
    %c3_i32 = arith.constant 3 : i32
    %162 = vector.broadcast %c3_i32 : i32 to vector<16x16xi32>
    %163 = arith.cmpi eq, %122, %162 : vector<16x16xi32>
    %cst_106 = arith.constant 0.000000e+00 : f32
    %164 = vector.broadcast %cst_106 : f32 to vector<16x16xf32>
    %165 = arith.select %163, %161, %164 : vector<16x16xi1>, vector<16x16xf32>
    %166 = arith.addf %155, %165 : vector<16x16xf32>
    %c7_i32 = arith.constant 7 : i32
    %167 = vector.broadcast %c7_i32 : i32 to vector<16x16xi32>
    %168 = arith.cmpi eq, %122, %167 : vector<16x16xi32>
    %cst_107 = arith.constant 0.000000e+00 : f32
    %169 = vector.broadcast %cst_107 : f32 to vector<16x16xf32>
    %170 = arith.select %168, %161, %169 : vector<16x16xi1>, vector<16x16xf32>
    %171 = arith.addf %160, %170 : vector<16x16xf32>
    %c1_108 = arith.constant 1 : index
    %c0_109 = arith.constant 0 : index
    %172 = vector.load %arg5[%c1_108, %c0_109] : memref<18x18xf32, #tpu.memory_space<vmem>>, vector<16x16xf32>
    %c4_i32_110 = arith.constant 4 : i32
    %173 = vector.broadcast %c4_i32_110 : i32 to vector<16x16xi32>
    %174 = arith.cmpi eq, %122, %173 : vector<16x16xi32>
    %cst_111 = arith.constant 0.000000e+00 : f32
    %175 = vector.broadcast %cst_111 : f32 to vector<16x16xf32>
    %176 = arith.select %174, %172, %175 : vector<16x16xi1>, vector<16x16xf32>
    %177 = arith.addf %166, %176 : vector<16x16xf32>
    %c0_i32_112 = arith.constant 0 : i32
    %178 = vector.broadcast %c0_i32_112 : i32 to vector<16x16xi32>
    %179 = arith.cmpi eq, %122, %178 : vector<16x16xi32>
    %cst_113 = arith.constant 0.000000e+00 : f32
    %180 = vector.broadcast %cst_113 : f32 to vector<16x16xf32>
    %181 = arith.select %179, %172, %180 : vector<16x16xi1>, vector<16x16xf32>
    %182 = arith.addf %171, %181 : vector<16x16xf32>
    %c0_114 = arith.constant 0 : index
    %c0_115 = arith.constant 0 : index
    %183 = vector.load %arg5[%c0_114, %c0_115] : memref<18x18xf32, #tpu.memory_space<vmem>>, vector<16x16xf32>
    %c5_i32_116 = arith.constant 5 : i32
    %184 = vector.broadcast %c5_i32_116 : i32 to vector<16x16xi32>
    %185 = arith.cmpi eq, %122, %184 : vector<16x16xi32>
    %cst_117 = arith.constant 0.000000e+00 : f32
    %186 = vector.broadcast %cst_117 : f32 to vector<16x16xf32>
    %187 = arith.select %185, %183, %186 : vector<16x16xi1>, vector<16x16xf32>
    %188 = arith.addf %177, %187 : vector<16x16xf32>
    %c1_i32_118 = arith.constant 1 : i32
    %189 = vector.broadcast %c1_i32_118 : i32 to vector<16x16xi32>
    %190 = arith.cmpi eq, %122, %189 : vector<16x16xi32>
    %cst_119 = arith.constant 0.000000e+00 : f32
    %191 = vector.broadcast %cst_119 : f32 to vector<16x16xf32>
    %192 = arith.select %190, %183, %191 : vector<16x16xi1>, vector<16x16xf32>
    %193 = arith.addf %182, %192 : vector<16x16xf32>
    %c0_120 = arith.constant 0 : index
    %c1_121 = arith.constant 1 : index
    %194 = vector.load %arg5[%c0_120, %c1_121] : memref<18x18xf32, #tpu.memory_space<vmem>>, vector<16x16xf32>
    %c6_i32_122 = arith.constant 6 : i32
    %195 = vector.broadcast %c6_i32_122 : i32 to vector<16x16xi32>
    %196 = arith.cmpi eq, %122, %195 : vector<16x16xi32>
    %cst_123 = arith.constant 0.000000e+00 : f32
    %197 = vector.broadcast %cst_123 : f32 to vector<16x16xf32>
    %198 = arith.select %196, %194, %197 : vector<16x16xi1>, vector<16x16xf32>
    %199 = arith.addf %188, %198 : vector<16x16xf32>
    %c2_i32_124 = arith.constant 2 : i32
    %200 = vector.broadcast %c2_i32_124 : i32 to vector<16x16xi32>
    %201 = arith.cmpi eq, %122, %200 : vector<16x16xi32>
    %cst_125 = arith.constant 0.000000e+00 : f32
    %202 = vector.broadcast %cst_125 : f32 to vector<16x16xf32>
    %203 = arith.select %201, %194, %202 : vector<16x16xi1>, vector<16x16xf32>
    %204 = arith.addf %193, %203 : vector<16x16xf32>
    %c0_126 = arith.constant 0 : index
    %c2_127 = arith.constant 2 : index
    %205 = vector.load %arg5[%c0_126, %c2_127] : memref<18x18xf32, #tpu.memory_space<vmem>>, vector<16x16xf32>
    %c7_i32_128 = arith.constant 7 : i32
    %206 = vector.broadcast %c7_i32_128 : i32 to vector<16x16xi32>
    %207 = arith.cmpi eq, %122, %206 : vector<16x16xi32>
    %cst_129 = arith.constant 0.000000e+00 : f32
    %208 = vector.broadcast %cst_129 : f32 to vector<16x16xf32>
    %209 = arith.select %207, %205, %208 : vector<16x16xi1>, vector<16x16xf32>
    %210 = arith.addf %199, %209 : vector<16x16xf32>
    %c3_i32_130 = arith.constant 3 : i32
    %211 = vector.broadcast %c3_i32_130 : i32 to vector<16x16xi32>
    %212 = arith.cmpi eq, %122, %211 : vector<16x16xi32>
    %cst_131 = arith.constant 0.000000e+00 : f32
    %213 = vector.broadcast %cst_131 : f32 to vector<16x16xf32>
    %214 = arith.select %212, %205, %213 : vector<16x16xi1>, vector<16x16xf32>
    %215 = arith.addf %204, %214 : vector<16x16xf32>
    %216 = arith.subf %88, %210 : vector<16x16xf32>
    %217 = arith.subf %88, %215 : vector<16x16xf32>
    %218 = arith.minimumf %216, %217 : vector<16x16xf32>
    %cst_132 = arith.constant 0.000000e+00 : f32
    %219 = vector.broadcast %cst_132 : f32 to vector<16x16xf32>
    %220 = arith.cmpf ogt, %218, %219 : vector<16x16xf32>
    %cst_133 = arith.constant 0.000000e+00 : f32
    %221 = vector.broadcast %cst_133 : f32 to vector<16x16xf32>
    %222 = arith.select %220, %88, %221 : vector<16x16xi1>, vector<16x16xf32>
    %c0_134 = arith.constant 0 : index
    %c0_135 = arith.constant 0 : index
    %c0_136 = arith.constant 0 : index
    %223 = vector.load %arg2[%c0_134, %c0_135, %c0_136] : memref<1x16x16xf32, #tpu.memory_space<vmem>>, vector<1x16x16xf32>
    %224 = vector.shape_cast %223 : vector<1x16x16xf32> to vector<16x16xf32>
    %225 = vector.shape_cast %222 : vector<16x16xf32> to vector<1x16x16xf32>
    tpu.vector_store %arg2[%c0_134, %c0_135, %c0_136], %225 {strides = array<i32>} : memref<1x16x16xf32, #tpu.memory_space<vmem>>, vector<1x16x16xf32>,
    return
  }
  func.func @transform_0(%arg0: i32) -> (i32, i32, i32) {
    %c0_i32 = arith.constant 0 : i32
    %c0_i32_0 = arith.constant 0 : i32
    %c0_i32_1 = arith.constant 0 : i32
    return %arg0, %c0_i32, %c0_i32_0 : i32, i32, i32
  }
  func.func @transform_1(%arg0: i32) -> (i32, i32, i32) {
    %c0_i32 = arith.constant 0 : i32
    %c0_i32_0 = arith.constant 0 : i32
    %c0_i32_1 = arith.constant 0 : i32
    return %arg0, %c0_i32, %c0_i32_0 : i32, i32, i32
  }
}

</mosaic_0001>

<bundles_post_ra>
// kernel: canny_edge_pallas.3
= control target key start
LH: loop header
LB: loop body
LE: loop exit
PB: predicated region body
PF: predicated region fallthrough
CT: control target
= control target key end

     0   :  { %s678_s0 = inlined_call_operand.<no memory space> [shape: f32[1,1], index: 0, kind: input, shape index: {}]   ;;  %s679_s1 = inlined_call_operand.vmem [shape: f32[2,16,16], index: 1, kind: input, shape index: {}]   ;;  %s680_s2 = inlined_call_operand.hbm [shape: f32[2,16,16], index: 2, kind: output, shape index: {}]  }
   0x1   :  { %7 = sst [smem:[#allocation3]] %s678_s0 }
   0x2   :  { %8 = vsyncpa [#allocation5], 0 }
   0x3   :  { %10 = vsyncpa [#allocation5 + $0x1], 0  ;;  %s536_s11 = smov 0   ;;  %s538_s12 = smov 0  }
   0x4   :  { %s540_s13 = smov 0   ;;  %s542_s14 = smov 0  }
   0x5 LB: > { %s557_s0 = sadd.s32 4294967295, %s502_s14   ;;  %s353_s15 = sadd.s32 4294967294, %s502_s14   ;;  %s502_s14 = sphi %s542_s14, %s690_s14   ;;  %s498_s13 = sphi %s540_s13, %s689_s13   ;;  %s494_s12 = sphi %s538_s12, %s688_s12   ;;  %s490_s11 = sphi %s536_s11, %s687_s11  }
   0x6   : > { %s561_s16 = sadd.s32 1, %s502_s14   ;;  %s70_s17 = sadd.s32 1, %s498_s13 }
   0x7   : > { %s67_s18 = ssub.s32 %s502_s14, %s561_s16  ;;  %p80_p0 = scmp.ne.s32.totalorder %s498_s13, %s494_s12 }
   0x8   : > { %p68_p1 = scmp.eq.s32.totalorder %s67_s18, 0  ;;  %p81_p2 = scmp.eq.s32.totalorder %s557_s0, 1 }
   0x9   : > { %p86_p3 = scmp.ne.s32.totalorder %s494_s12, %s490_s11  ;;  %p87_p4 = scmp.eq.s32.totalorder %s353_s15, 1 }
   0xa   : > { %s572_s19 = scalar_select %p68_p1, %s498_s13, %s70_s17  }
   0xb   : > { %p574_p5 = por %p81_p2, %p80_p0  ;;  %p578_p6 = por %p87_p4, %p86_p3 }
   0xc   : > { %p356_p7 = scmp.ge.s32.totalorder %s502_s14, 1  ;;  %p116_p8 = scmp.lt.s32.totalorder %s502_s14, 3 }
   0xe   : > { %p117_p9 = pnand %p356_p7, %p116_p8 }
   0xf   : > { %p138_p10 = scmp.lt.s32.totalorder (!%p117_p9), %s557_s0, 1  ;;  %s143_s22 = sld [smem:[#allocation3]] (!%p117_p9) }
  0x10   : > { %120 = sbr.rel (%p117_p9) target bundleno = 556 (0x22c), region = 28  ;;  %s135_s23 = sand.u32 (!%p117_p9), 1, %s494_s12  }
  0x11   : > { %s357_s25 = sshll.u32 (!%p117_p9), %s135_s23, 4  ;;  %s509_s30 = smov (!%p117_p9), 1  }
  0x12   : > { %s607_s3 = scalar_lea.vmem (!%p117_p9), [#allocation4], %s357_s25  ;;  %s609_s4 = smov (!%p117_p9), 0  }
  0x15   : > { %vm157_vm0 = vcmask 146432   ;;  %vm160_vm1 = vcmask 140288   ;;  %v508_v0 = vmov 0.0   ;;  %s139_s24 = scalar_select %p138_p10, %s557_s0, 1  ;;  %v146_v3 = vstv %s143_s22 }
  0x16   : > { %158 = vst.msk [vmem:[#allocation2] sm:$0xff] %vm157_vm0, %v508_v0  ;;  %159 = vst.msk [vmem:[#allocation2 + $0x8] sm:$0xff] %vm157_vm0, %v508_v0  ;;  %vm170_vm10 = vcmask 138248  }
  0x17   : > { %161 = vst.msk [vmem:[#allocation2 + $0x10] sm:$0x3] %vm160_vm1, %v508_v0  ;;  %s365_s26 = sshll.u32 %s139_s24, 4 }
  0x18   : > { %s142_s29 = scalar_lea.vmem %s679_s1, %s365_s26 }
  0x19   : > { %v144_v1 = vld [vmem:[%s142_s29] sm:$0xff]  ;;  %v145_v2 = vld [vmem:[%s142_s29 + $0x8] sm:$0xff] }
  0x1a   : > { %vm147_vm2 = vcmp.ge.f32.partialorder %v144_v1, %v146_v3  ;;  %vm148_vm3 = vcmp.ge.f32.partialorder %v145_v2, %v146_v3  ;;  %vm151_vm4 = vcmp.lt.f32.partialorder %v144_v1, %v146_v3  ;;  %vm152_vm5 = vcmp.lt.f32.partialorder %v145_v2, %v146_v3 }
  0x1b   : > { %v149_v4 = vsel %vm147_vm2, 1.0, %v508_v0  ;;  %v150_v5 = vsel %vm148_vm3, 1.0, %v508_v0  ;;  %vm153_vm6 = vcmp.ge.f32.partialorder %v144_v1, 0.00392  ;;  %vm154_vm7 = vcmp.ge.f32.partialorder %v145_v2, 0.00392 }
  0x1c   : > { %vm597_vm8 = vmand %vm151_vm4, %vm153_vm6  ;;  %v423_v7 = vpack.i.bf16 %v150_v5, %v149_v4 }
  0x1d   : > { %vm601_vm9 = vmand %vm152_vm5, %vm154_vm7 }
  0x1e   : > { %424 = vrot.lane.b32.xlu0 %v423_v7, %s509_s30 }
  0x90   : > { %v425_v9 = vpop.permute.xlu0 %424 }
  0x91   : > { %v427_v10 = vunpack.i.h.bf16 %v425_v9  ;;  %v426_v11 = vunpack.i.l.bf16 %v425_v9 }
  0x93   : > { %172 = vst.msk [vmem:[#allocation2 + $0x9] sm:$0xff] %vm170_vm10, %v427_v10  ;;  %171 = vst.msk [vmem:[#allocation2 + $0x1] sm:$0xff] %vm170_vm10, %v426_v11 }
  0x94 LB: >> { %s510_s5 = smov 126   ;;  %s511_s6 = smov 127   ;;  %v512_v42 = vmov 0.0   ;;  %s506_s4 = sphi %s609_s4, %s178_s4  }
  0x95   : >> { %s513_s7 = smov 1   ;;  %s178_s4 = sadd.s32 1, %s506_s4  }
  0x96   : >> { %p175_p11 = scmp.ge.s32.totalorder %s178_s4, 256  }
  0x97   : > { %s514_s8 = smov (%p175_p11), 127   ;;  %s366_s9 = sshll.u32 (%p175_p11), %s557_s0, 8  ;;  %vm269_vm1 = vcmask (%p175_p11), 130048  }
  0x98   : > { %s286_s10 = sshll.u32 (%p175_p11), %s607_s3, 4  ;;  %s630_s18 = scalar_lea.hbm (%p175_p11), %s680_s2, %s366_s9  ;;  %s632_s10 = int_to_ptr.vmem [resolvable:$true] %s286_s10 }
  0x99   : > { %s638_s22 = scalar_lea.sflag (%p175_p11), [#allocation5], %s135_s23  ;;  %s438_s0 = scalar_lea.vmem (%p175_p11), %s632_s10, 256 }
  0x9a   : >> { %v179_v12 = vld [vmem:[#allocation2] sm:$0xff]  ;;  %v180_v13 = vld [vmem:[#allocation2 + $0x8] sm:$0xff]  ;;  %p439_p12 = scmp.ne.s32.totalorder (%p175_p11), %s632_s10, %s438_s0  ;;  %s515_s24 = smov (%p175_p11), [#allocation4]  }
  0x9b   : >> { %193 = vrot.lane.b32.xlu1 %v179_v12, %s510_s5  ;;  %185 = vrot.lane.b32.xlu0 %v179_v12, %s511_s6  ;;  %v202_v14 = vld [vmem:[#allocation2 + $0x9] sm:$0xff]  ;;  %v201_v15 = vld [vmem:[#allocation2 + $0x1] sm:$0xff]  ;;  %s442_s25 = sshll.u32 (%p175_p11), %s515_s24, 4  ;;  %s443_s25 = int_to_ptr.vmem [resolvable:$false] %s442_s25 }
  0x9c   : >> { %v216_v16 = vld [vmem:[#allocation2 + $0xa] sm:$0xff]  ;;  %v215_v17 = vld [vmem:[#allocation2 + $0x2] sm:$0xff]  ;;  %p440_p13 = pnand (%p175_p11), %p439_p12, %p574_p5  ;;  %s444_s26 = scalar_lea.vmem (%p175_p11), %s443_s25, 512 }
  0x9d   : > { %p445_p1 = scmp.lt.s32.totalorder (%p175_p11), %s632_s10, %s443_s25  ;;  %p446_p2 = scmp.lt.s32.totalorder (%p175_p11), %s444_s26, %s438_s0 }
  0x9e   : > { %p441_p0 = pneg (%p175_p11), %p440_p13 }
  0x9f   : >> { %195 = vrot.lane.b32.xlu1 %v180_v13, %s510_s5  ;;  %187 = vrot.lane.b32.xlu0 %v180_v13, %s511_s6  ;;  %p447_p3 = por (%p175_p11), %p446_p2, %p445_p1 }
  0xa1   : > { %p448_p4 = pnand (%p175_p11), %p447_p3, %p441_p0 }
  0xa3   : >> { %209 = vrot.lane.b32.xlu1 %v202_v14, %s510_s5  ;;  %207 = vrot.lane.b32.xlu0 %v201_v15, %s510_s5 }
  0xa7   : >> { %223 = vrot.lane.b32.xlu1 %v216_v16, %s511_s6  ;;  %221 = vrot.lane.b32.xlu0 %v215_v17, %s511_s6 }
  0xab   : >> { %231 = vrot.lane.b32.xlu1 %v216_v16, %s510_s5  ;;  %229 = vrot.lane.b32.xlu0 %v215_v17, %s510_s5 }
 0x10d   : >> { %v194_v18 = vpop.permute.xlu1 %193  ;;  %v186_v19 = vpop.permute.xlu0 %185 }
 0x10e   : >> { %v191_v20 = vadd.f32 %v186_v19, %v179_v12 }
 0x110   : >> { %v199_v21 = vadd.f32 %v194_v18, %v191_v20 }
 0x111   : >> { %v196_v22 = vpop.permute.xlu1 %195  ;;  %v188_v23 = vpop.permute.xlu0 %187 }
 0x112   : >> { %v192_v24 = vadd.f32 %v188_v23, %v180_v13  ;;  %v203_v26 = vadd.f32 %v201_v15, %v199_v21 }
 0x114   : >> { %v200_v25 = vadd.f32 %v196_v22, %v192_v24 }
 0x115   : >> { %v210_v27 = vpop.permute.xlu1 %209  ;;  %v208_v28 = vpop.permute.xlu0 %207 }
 0x116   : >> { %v204_v29 = vadd.f32 %v202_v14, %v200_v25  ;;  %v213_v30 = vadd.f32 %v208_v28, %v203_v26 }
 0x118   : >> { %v214_v31 = vadd.f32 %v210_v27, %v204_v29  ;;  %v217_v32 = vadd.f32 %v215_v17, %v213_v30 }
 0x119   : >> { %v224_v33 = vpop.permute.xlu1 %223  ;;  %v222_v34 = vpop.permute.xlu0 %221 }
 0x11a   : >> { %v218_v35 = vadd.f32 %v216_v16, %v214_v31  ;;  %v227_v37 = vadd.f32 %v222_v34, %v217_v32 }
 0x11c   : >> { %v228_v36 = vadd.f32 %v224_v33, %v218_v35 }
 0x11d   : >> { %v232_v38 = vpop.permute.xlu1 %231  ;;  %v230_v39 = vpop.permute.xlu0 %229 }
 0x11e   : >> { %v236_v40 = vadd.f32 %v232_v38, %v228_v36  ;;  %v235_v41 = vadd.f32 %v230_v39, %v227_v37 }
 0x120   : >> { %vm238_vm11 = vcmp.gt.f32.partialorder %v236_v40, 0.0  ;;  %vm237_vm12 = vcmp.gt.f32.partialorder %v235_v41, 0.0 }
 0x121   : >> { %vm240_vm13 = vmand %vm601_vm9, %vm238_vm11 }
 0x122   : >> { %v242_v43 = vsel %vm240_vm13, 1.0, %v512_v42  ;;  %vm239_vm14 = vmand %vm597_vm8, %vm237_vm12 }
 0x123   : >> { %v241_v44 = vsel %vm239_vm14, 1.0, %v512_v42 }
 0x124   : >> { %v428_v45 = vpack.i.bf16 %v242_v43, %v241_v44 }
 0x126   : >> { %429 = vrot.lane.b32.xlu0 %v428_v45, %s513_s7 }
 0x198   : >> { %v430_v46 = vpop.permute.xlu0 %429 }
 0x199   : >> { %v432_v47 = vunpack.i.h.bf16 %v430_v46  ;;  %v431_v48 = vunpack.i.l.bf16 %v430_v46  ;;  %177 = sbr.rel (!%p175_p11) target bundleno = 148 (0x94), region = 70 }
 0x19b   : >> { %v252_v49 = vmax.f32 %v202_v14, %v432_v47  ;;  %v251_v50 = vmax.f32 %v201_v15, %v431_v48 }
 0x19d   : >> { %254 = vst.msk [vmem:[#allocation2 + $0x9] sm:$0xff] %vm170_vm10, %v252_v49  ;;  %253 = vst.msk [vmem:[#allocation2 + $0x1] sm:$0xff] %vm170_vm10, %v251_v50 }
 0x1a4   : > { %v255_v51 = vld [vmem:[#allocation2 + $0x1] sm:$0xff]  ;;  %v256_v52 = vld [vmem:[#allocation2 + $0x9] sm:$0xff] }
 0x1a5   : > { %vm257_vm15 = vcmp.gt.f32.partialorder %v255_v51, 0.0  ;;  %vm258_vm0 = vcmp.gt.f32.partialorder %v256_v52, 0.0 }
 0x1a6   : > { %v259_v53 = vsel %vm257_vm15, 255.0, %v508_v0  ;;  %v260_v54 = vsel %vm258_vm0, 255.0, %v508_v0 }
 0x1a7   : > { %v433_v55 = vpack.i.bf16 %v260_v54, %v259_v53 }
 0x1a9   : > { %434 = vrot.lane.b32.xlu0 %v433_v55, %s514_s8 }
 0x21b   : > { %v435_v56 = vpop.permute.xlu0 %434 }
 0x21c   : > { %v437_v57 = vunpack.i.h.bf16 %v435_v56  ;;  %v436_v58 = vunpack.i.l.bf16 %v435_v56 }
 0x21e   : > { %271 = vst.msk [vmem:[%s607_s3 + $0x8] sm:$0xff] %vm269_vm1, %v437_v57  ;;  %270 = vst.msk [vmem:[%s607_s3] sm:$0xff] %vm269_vm1, %v436_v58 }
 0x21f   : > { %451 = shalt.err (!%p448_p4)
}
 0x220   : > { %s452_s23 = scalar_lea.hbm %s630_s18, 256  ;;  %s456_s29 = scalar_lea.hbm %s680_s2, 512 }
 0x221   : > { %p453_p7 = scmp.ne.s32.totalorder %s630_s18, %s452_s23  ;;  %p457_p10 = scmp.lt.s32.totalorder %s630_s18, %s680_s2 }
 0x222   : > { %p458_p11 = scmp.lt.s32.totalorder %s456_s29, %s452_s23 }
 0x223   : > { %p454_p8 = pnand %p453_p7, %p574_p5 }
 0x224   : > { %p459_p12 = por %p458_p11, %p457_p10 }
 0x225   : > { %p455_p9 = pneg %p454_p8 }
 0x227   : > { %p460_p13 = pnand %p459_p12, %p455_p9 }
 0x229   : > { %463 = shalt.err (!%p460_p13)
}
 0x22a   : > { %s516_s4 = smov 128   ;;  %s517_s5 = smov 8  }
 0x22b   : > { %367 = dma.vmem_to_hbm [thread:$0]  (%p574_p5), %s632_s10, 256, %s630_s18, %s638_s22, %s516_s4, %s516_s4, %s517_s5  }
 0x22c PF: > { %p373_p0 = scmp.ge.s32.totalorder %s502_s14, 2  ;;  %s301_s6 = sand.u32 1, %s490_s11  }
 0x22d   : > { %s302_s7 = scalar_lea.sflag [#allocation5], %s301_s6 }
 0x22e   : > { %p370_p1 = pnand %p373_p0, %p578_p6 }
 0x230   : > { %p371_p2 = pneg %p370_p1 }
 0x232   : > { %485 = dma.done.wait (%p371_p2), %s302_s7, 256  }
 0x233   : > { %487 = vsyncadd (%p371_p2), %s302_s7, 4294967040  ;;  %p13_p3 = scmp.ge.s32.totalorder %s561_s16, 4   ;;  %s687_s11 = smov %s494_s12 }
 0x234   : > { %s688_s12 = smov %s498_s13  ;;  %s689_s13 = smov %s572_s19 }
 0x235   : > { %s690_s14 = smov %s561_s16  ;;  %15 = sbr.rel (!%p13_p3) target bundleno = 5 (0x5), region = 81 }
 0x23a   :  { %307 = vsyncpa [#allocation5], 1 }
 0x23b   :  { %309 = vsyncpa [#allocation5 + $0x1], 1 }

// kernel: canny_edge_pallas.2
= control target key start
LH: loop header
LB: loop body
LE: loop exit
PB: predicated region body
PF: predicated region fallthrough
CT: control target
= control target key end

     0   :  { %6 = vsyncpa [#allocation6], 0  ;;  %s1018_s0 = inlined_call_operand.hbm [shape: f32[2,16,16], index: 0, kind: input, shape index: {}]   ;;  %s1019_s1 = inlined_call_operand.vmem [shape: f32[2,16,16], index: 1, kind: output, shape index: {}]  }
   0x1   :  { %8 = vsyncpa [#allocation6 + $0x1], 0  ;;  %s762_s6 = smov 0   ;;  %s764_s7 = smov 0  }
   0x2   :  { %s766_s8 = smov 0   ;;  %s768_s9 = smov 0  }
   0x3 LB: > { %s781_s10 = sadd.s32 4294967295, %s739_s9   ;;  %s784_s11 = sadd.s32 1, %s739_s9   ;;  %s739_s9 = sphi %s768_s9, %s1031_s9   ;;  %s735_s8 = sphi %s766_s8, %s1030_s8   ;;  %s731_s7 = sphi %s764_s7, %s1029_s7   ;;  %s727_s6 = sphi %s762_s6, %s1028_s6  }
   0x4   : > { %s18_s12 = ssub.s32 %s739_s9, %s784_s11  ;;  %s21_s13 = sadd.s32 1, %s735_s8 }
   0x5   : > { %p19_p0 = scmp.eq.s32.totalorder %s18_s12, 0  ;;  %p28_p1 = scmp.ne.s32.totalorder %s735_s8, %s731_s7 }
   0x6   : > { %p29_p2 = scmp.eq.s32.totalorder %s739_s9, 0  ;;  %p34_p3 = scmp.ne.s32.totalorder %s731_s7, %s727_s6 }
   0x7   : > { %s794_s14 = scalar_select %p19_p0, %s735_s8, %s21_s13  }
   0x8   : > { %p30_p4 = por %p29_p2, %p28_p1  ;;  %p35_p5 = scmp.eq.s32.totalorder %s781_s10, 0 }
   0x9   : > { %p628_p6 = scmp.lt.s32.totalorder %s739_s9, 2  ;;  %s84_s16 = sand.u32 1, %s735_s8  }
   0xa   : > { %p798_p7 = por %p35_p5, %p34_p3  ;;  %s609_s17 = sshll.u32 %s84_s16, 4 }
   0xb   : > { %s620_s18 = sshll.u32 %s739_s9, 8  ;;  %s88_s22 = scalar_lea.vmem [#allocation5], %s609_s17 }
   0xc   : > { %s1022_s15 = scalar_select %p798_p7, 1, 0 }
   0xd   : > { %s807_s21 = scalar_lea.hbm %s1018_s0, %s620_s18  ;;  %s95_s23 = sshll.u32 %s88_s22, 4  ;;  %s809_s23 = int_to_ptr.vmem [resolvable:$true] %s95_s23 }
   0xe   : > { %p811_p8 = pnand %p628_p6, %p30_p4  ;;  %s816_s25 = scalar_lea.sflag [#allocation6], %s84_s16 }
   0xf   : > { %s677_s26 = scalar_lea.hbm %s807_s21, 256  ;;  %s682_s29 = scalar_lea.hbm %s1018_s0, 512 }
  0x10   : > { %p678_p10 = scmp.ne.s32.totalorder %s807_s21, %s677_s26  ;;  %p679_p11 = pneg %p811_p8 }
  0x11   : > { %p683_p0 = scmp.lt.s32.totalorder %s807_s21, %s1018_s0  ;;  %p684_p1 = scmp.lt.s32.totalorder %s682_s29, %s677_s26 }
  0x12   : > { %p680_p12 = pnand %p679_p11, %p678_p10 }
  0x13   : > { %p685_p2 = por %p684_p1, %p683_p0 }
  0x14   : > { %p681_p13 = pneg %p680_p12 }
  0x16   : > { %p686_p3 = pnand %p685_p2, %p681_p13 }
  0x18   : > { %689 = shalt.err (!%p686_p3)
}
  0x19   : > { %s690_s3 = scalar_lea.vmem %s809_s23, 256  ;;  %s741_s4 = smov [#allocation5]  }
  0x1a   : > { %p691_p4 = scmp.ne.s32.totalorder %s809_s23, %s690_s3  ;;  %s695_s5 = sshll.u32 %s741_s4, 4  ;;  %s696_s5 = int_to_ptr.vmem [resolvable:$false] %s695_s5 }
  0x1b   : > { %s697_s6 = scalar_lea.vmem %s696_s5, 512  ;;  %p698_p10 = scmp.lt.s32.totalorder %s809_s23, %s696_s5 }
  0x1c   : > { %p693_p5 = pnand %p691_p4, %p679_p11  ;;  %p699_p12 = scmp.lt.s32.totalorder %s697_s6, %s690_s3 }
  0x1e   : > { %p694_p6 = pneg %p693_p5  ;;  %p700_p9 = por %p699_p12, %p698_p10 }
  0x20   : > { %p701_p7 = pnand %p700_p9, %p694_p6 }
  0x22   : > { %704 = shalt.err (!%p701_p7)
}
  0x23   : > { %s742_s12 = smov 128   ;;  %s743_s13 = smov 8  }
  0x24   : > { %627 = dma.hbm_to_vmem [thread:$0]  (!%p811_p8), %s807_s21, 256, %s809_s23, %s816_s25, %s742_s12, %s742_s12, %s743_s13  }
  0x25   : > { %p103_p11 = scmp.lt.s32.totalorder %s739_s9, 3  ;;  %p1024_p13 = scmp.ge.s32.totalorder %s739_s9, 1 }
  0x27   : > { %p104_p0 = pnand %p1024_p13, %p103_p11 }
  0x28   : > { %s109_s16 = sand.u32 (!%p104_p0), 1, %s731_s7   ;;  %p1025_p7 = scmp.ne.s32.totalorder (!%p104_p0), %s1022_s15, 0 }
  0x29   : > { %107 = sbr.rel (%p104_p0) target bundleno = 1043 (0x413), region = 24  ;;  %s613_s17 = sshll.u32 (!%p104_p0), %s109_s16, 4 }
  0x2a   : > { %s110_s18 = scalar_lea.sflag (!%p104_p0), [#allocation6], %s109_s16  ;;  %s113_s19 = scalar_lea.vmem (!%p104_p0), [#allocation5], %s613_s17 }
  0x2e   : > { %722 = dma.done.wait (%p1025_p7), %s110_s18, 256  }
  0x2f   : > { %724 = vsyncadd (%p1025_p7), %s110_s18, 4294967040  ;;  %vm139_vm0 = vcmask 162816   ;;  %v744_v0 = vmov 0.0   ;;  %v137_v1 = vld [vmem:[%s113_s19] sm:$0xff]  ;;  %s745_s9 = smov 2   ;;  %v138_v2 = vld [vmem:[%s113_s19 + $0x8] sm:$0xff] }
  0x30   : > { %140 = vst.msk [vmem:[#allocation2] sm:$0xff] %vm139_vm0, %v744_v0  ;;  %141 = vst.msk [vmem:[#allocation2 + $0x8] sm:$0xff] %vm139_vm0, %v744_v0  ;;  %144 = vrot.lane.b32.xlu0 %v137_v1, %s745_s9  ;;  %vm150_vm1 = vcmask 146448   ;;  %vm1021_vm2 = vcmask 130048   ;;  %s746_s15 = smov 126   ;;  %vm200_vm3 = vcmask 125952  }
  0x31   : > { %198 = vst.msk [vmem:[#allocation3] sm:$0xff] %vm1021_vm2, %v744_v0  ;;  %199 = vst.msk [vmem:[#allocation3 + $0x8] sm:$0xff] %vm1021_vm2, %v744_v0  ;;  %s747_s20 = smov 125   ;;  %s748_s21 = smov 124   ;;  %vm230_vm4 = vcmask 146432   ;;  %vm233_vm5 = vcmask 140288  }
  0x32   : > { %201 = vst.msk [vmem:[#allocation3 + $0x10] sm:$0xf] %vm200_vm3, %v744_v0  ;;  %s749_s22 = smov 127   ;;  %s750_s23 = smov 1   ;;  %vm243_vm6 = vcmask 138248  }
  0x33   : > { %231 = vst.msk [vmem:[#allocation4] sm:$0xff] %vm230_vm4, %v744_v0  ;;  %232 = vst.msk [vmem:[#allocation4 + $0x8] sm:$0xff] %vm230_vm4, %v744_v0  ;;  %p132_p8 = scmp.lt.s32.totalorder %s781_s10, 1 }
  0x34   : > { %146 = vrot.lane.b32.xlu0 %v138_v2, %s745_s9  ;;  %234 = vst.msk [vmem:[#allocation4 + $0x10] sm:$0x3] %vm233_vm5, %v744_v0 }
  0x35   : > { %s1033_s10 = smov (!%p132_p8, %s781_s10), 1 }
  0x36   : > { %s621_s24 = sshll.u32 %s1033_s10, 4 }
  0x37   : > { %s136_s27 = scalar_lea.vmem %s1019_s1, %s621_s24 }
  0xa2   : > { %v145_v3 = vpop.permute.xlu0 %144 }
  0xa3   : > { %151 = vst.msk [vmem:[#allocation2] sm:$0xff] %vm150_vm1, %v145_v3 }
  0xa6   : > { %v147_v4 = vpop.permute.xlu0 %146 }
  0xa7   : > { %152 = vst.msk [vmem:[#allocation2 + $0x8] sm:$0xff] %vm150_vm1, %v147_v4 }
  0xaa   : > { %v153_v5 = vld [vmem:[#allocation2] sm:$0xff] }
  0xab   : > { %171 = vrot.lane.b32.xlu0 %v153_v5, %s746_s15  ;;  %v157_v6 = vmul.f32 0.60653067, %v153_v5  ;;  %v155_v8 = vmul.f32 0.13533528, %v153_v5 }
  0xae   : > { %v154_v7 = vld [vmem:[#allocation2 + $0x8] sm:$0xff] }
  0xaf   : > { %179 = vrot.lane.b32.xlu0 %v157_v6, %s747_s20  ;;  %173 = vrot.lane.b32.xlu1 %v154_v7, %s746_s15  ;;  %v158_v9 = vmul.f32 0.60653067, %v154_v7  ;;  %v156_v10 = vmul.f32 0.13533528, %v154_v7 }
  0xb3   : > { %189 = vrot.lane.b32.xlu0 %v155_v8, %s748_s21  ;;  %161 = vrot.lane.b32.xlu1 %v157_v6, %s749_s22 }
  0xb7   : > { %163 = vrot.lane.b32.xlu1 %v158_v9, %s749_s22 }
  0xbb   : > { %181 = vrot.lane.b32.xlu1 %v158_v9, %s747_s20 }
  0xbf   : > { %191 = vrot.lane.b32.xlu1 %v156_v10, %s748_s21 }
 0x11d   : > { %v172_v11 = vpop.permute.xlu0 %171 }
 0x121   : > { %v174_v12 = vpop.permute.xlu1 %173  ;;  %v180_v13 = vpop.permute.xlu0 %179 }
 0x125   : > { %v162_v14 = vpop.permute.xlu1 %161  ;;  %v190_v20 = vpop.permute.xlu0 %189 }
 0x126   : > { %v167_v15 = vadd.f32 %v162_v14, %v155_v8 }
 0x128   : > { %v177_v16 = vadd.f32 %v172_v11, %v167_v15 }
 0x129   : > { %v164_v17 = vpop.permute.xlu1 %163 }
 0x12a   : > { %v185_v18 = vadd.f32 %v180_v13, %v177_v16  ;;  %v168_v19 = vadd.f32 %v164_v17, %v156_v10 }
 0x12c   : > { %v195_v21 = vadd.f32 %v190_v20, %v185_v18  ;;  %v178_v22 = vadd.f32 %v174_v12, %v168_v19 }
 0x12d   : > { %v182_v23 = vpop.permute.xlu1 %181 }
 0x12e   : > { %202 = vst.msk [vmem:[#allocation3 + $0x2] sm:$0xff] %vm1021_vm2, %v195_v21  ;;  %v186_v24 = vadd.f32 %v182_v23, %v178_v22 }
 0x131   : > { %v192_v25 = vpop.permute.xlu1 %191 }
 0x132   : > { %v196_v26 = vadd.f32 %v192_v25, %v186_v24 }
 0x134   : > { %203 = vst.msk [vmem:[#allocation3 + $0xa] sm:$0xff] %vm1021_vm2, %v196_v26 }
 0x135   : > { %v204_v27 = vld [vmem:[#allocation3] sm:$0xff] }
 0x136   : > { %v208_v28 = vld [vmem:[#allocation3 + $0x1] sm:$0xff]  ;;  %v206_v29 = vmul.f32 0.13533528, %v204_v27 }
 0x137   : > { %v210_v30 = vmul.f32 0.60653067, %v208_v28  ;;  %v214_v32 = vld [vmem:[#allocation3 + $0x2] sm:$0xff] }
 0x139   : > { %v212_v31 = vadd.f32 %v210_v30, %v206_v29 }
 0x13b   : > { %v218_v33 = vld [vmem:[#allocation3 + $0x3] sm:$0xff]  ;;  %v216_v36 = vadd.f32 %v214_v32, %v212_v31  ;;  %v219_v43 = vld [vmem:[#allocation3 + $0xb] sm:$0xff] }
 0x13c   : > { %v224_v34 = vld [vmem:[#allocation3 + $0x4] sm:$0xff]  ;;  %v220_v37 = vmul.f32 0.60653067, %v218_v33  ;;  %v225_v47 = vld [vmem:[#allocation3 + $0xc] sm:$0xff]  ;;  %v221_v49 = vmul.f32 0.60653067, %v219_v43 }
 0x13d   : > { %v205_v35 = vld [vmem:[#allocation3 + $0x8] sm:$0xff]  ;;  %v226_v41 = vmul.f32 0.13533528, %v224_v34  ;;  %v227_v51 = vmul.f32 0.13533528, %v225_v47 }
 0x13e   : > { %v207_v38 = vmul.f32 0.13533528, %v205_v35  ;;  %v209_v39 = vld [vmem:[#allocation3 + $0x9] sm:$0xff]  ;;  %v222_v40 = vadd.f32 %v220_v37, %v216_v36 }
 0x13f   : > { %v211_v42 = vmul.f32 0.60653067, %v209_v39  ;;  %v215_v46 = vld [vmem:[#allocation3 + $0xa] sm:$0xff] }
 0x140   : > { %v228_v44 = vadd.f32 %v226_v41, %v222_v40  ;;  %v751_v40 = vmov 1  }
 0x141   : > { %v213_v45 = vadd.f32 %v211_v42, %v207_v38 }
 0x142   : > { %237 = vrot.lane.b32.xlu0 %v228_v44, %s750_s23 }
 0x143   : > { %v217_v48 = vadd.f32 %v215_v46, %v213_v45 }
 0x145   : > { %v223_v50 = vadd.f32 %v221_v49, %v217_v48 }
 0x147   : > { %v229_v52 = vadd.f32 %v227_v51, %v223_v50 }
 0x149   : > { %239 = vrot.lane.b32.xlu1 %v229_v52, %s750_s23 }
 0x1b4   : > { %v238_v53 = vpop.permute.xlu0 %237 }
 0x1b5   : > { %244 = vst.msk [vmem:[#allocation4 + $0x1] sm:$0xff] %vm243_vm6, %v238_v53 }
 0x1bb   : > { %v240_v54 = vpop.permute.xlu1 %239 }
 0x1bc   : > { %245 = vst.msk [vmem:[#allocation4 + $0x9] sm:$0xff] %vm243_vm6, %v240_v54  ;;  %v246_v55 = vld [vmem:[#allocation4] sm:$0xff] }
 0x1bd   : > { %250 = vrot.lane.b32.xlu0 %v246_v55, %s746_s15  ;;  %v288_v56 = vmul.f32 2.0, %v246_v55  ;;  %v258_v57 = vld [vmem:[#allocation4 + $0x1] sm:$0xff] }
 0x1be   : > { %v260_v60 = vmul.f32 2.0, %v258_v57 }
 0x1c1   : > { %292 = vrot.lane.b32.xlu0 %v288_v56, %s749_s22 }
 0x1c3   : > { %v247_v58 = vld [vmem:[#allocation4 + $0x8] sm:$0xff] }
 0x1c4   : > { %v274_v59 = vld [vmem:[#allocation4 + $0x2] sm:$0xff]  ;;  %252 = vrot.lane.b32.xlu1 %v247_v58, %s746_s15  ;;  %v275_v62 = vld [vmem:[#allocation4 + $0xa] sm:$0xff]  ;;  %v289_v63 = vmul.f32 2.0, %v247_v58 }
 0x1c5   : > { %v259_v61 = vld [vmem:[#allocation4 + $0x9] sm:$0xff]  ;;  %392 = vst.msk [vmem:[#allocation4] sm:$0xff] %vm230_vm4, %v744_v0  ;;  %266 = vrot.lane.b32.xlu0 %v260_v60, %s746_s15  ;;  %v304_v1 = vmul.f32 2.0, %v274_v59  ;;  %v305_v3 = vmul.f32 2.0, %v275_v62 }
 0x1c6   : > { %394 = vst.msk [vmem:[#allocation4 + $0x10] sm:$0x3] %vm233_vm5, %v744_v0  ;;  %v261_v2 = vmul.f32 2.0, %v259_v61 }
 0x1c7   : > { %393 = vst.msk [vmem:[#allocation4 + $0x8] sm:$0xff] %vm230_vm4, %v744_v0 }
 0x1c8   : > { %294 = vrot.lane.b32.xlu1 %v289_v63, %s749_s22 }
 0x1c9   : > { %308 = vrot.lane.b32.xlu0 %v304_v1, %s749_s22 }
 0x1cc   : > { %268 = vrot.lane.b32.xlu1 %v261_v2, %s746_s15 }
 0x1cd   : > { %280 = vrot.lane.b32.xlu0 %v274_v59, %s746_s15 }
 0x1d0   : > { %310 = vrot.lane.b32.xlu1 %v305_v3, %s749_s22 }
 0x1d4   : > { %282 = vrot.lane.b32.xlu1 %v275_v62, %s746_s15 }
 0x22f   : > { %v251_v4 = vpop.permute.xlu0 %250 }
 0x230   : > { %v256_v5 = vsub.f32 %v246_v55, %v251_v4 }
 0x232   : > { %v262_v10 = vadd.f32 %v260_v60, %v256_v5 }
 0x233   : > { %v293_v0 = vpop.permute.xlu0 %292 }
 0x234   : > { %v298_v6 = vadd.f32 %v293_v0, %v246_v55 }
 0x236   : > { %v253_v7 = vpop.permute.xlu1 %252  ;;  %v300_v9 = vadd.f32 %v298_v6, %v251_v4 }
 0x237   : > { %v267_v8 = vpop.permute.xlu0 %266  ;;  %v257_v11 = vsub.f32 %v247_v58, %v253_v7 }
 0x238   : > { %v272_v14 = vsub.f32 %v262_v10, %v267_v8  ;;  %v302_v16 = vsub.f32 %v300_v9, %v274_v59 }
 0x239   : > { %v263_v18 = vadd.f32 %v261_v2, %v257_v11 }
 0x23a   : > { %v295_v12 = vpop.permute.xlu1 %294  ;;  %v276_v20 = vadd.f32 %v274_v59, %v272_v14 }
 0x23b   : > { %v299_v13 = vadd.f32 %v295_v12, %v247_v58  ;;  %v309_v15 = vpop.permute.xlu0 %308 }
 0x23c   : > { %v314_v21 = vsub.f32 %v302_v16, %v309_v15 }
 0x23d   : > { %v301_v17 = vadd.f32 %v299_v13, %v253_v7 }
 0x23e   : > { %v269_v19 = vpop.permute.xlu1 %268 }
 0x23f   : > { %v273_v22 = vsub.f32 %v263_v18, %v269_v19  ;;  %v281_v23 = vpop.permute.xlu0 %280  ;;  %v303_v26 = vsub.f32 %v301_v17, %v275_v62 }
 0x240   : > { %v286_v24 = vsub.f32 %v276_v20, %v281_v23  ;;  %v316_v25 = vsub.f32 %v314_v21, %v281_v23 }
 0x241   : > { %v277_v31 = vadd.f32 %v275_v62, %v273_v22 }
 0x242   : > { %v311_v27 = vpop.permute.xlu1 %310  ;;  %v318_v28 = vmul.f32 %v286_v24, %v286_v24  ;;  %v320_v29 = vmul.f32 %v316_v25, %v316_v25  ;;  %v354_v30 = vand.u32 2147483647, %v286_v24  ;;  %v356_v34 = vand.u32 2147483647, %v316_v25 }
 0x243   : > { %v315_v32 = vsub.f32 %v303_v26, %v311_v27  ;;  %vm372_vm9 = vcmp.ge.f32.partialorder %v316_v25, 0.0  ;;  %vm370_vm10 = vcmp.ge.f32.partialorder %v286_v24, 0.0 }
 0x244   : > { %v322_v33 = vadd.f32 %v320_v29, %v318_v28  ;;  %v358_v35 = vmul.f32 0.41421357, %v354_v30  ;;  %v362_v36 = vmul.f32 2.4142134, %v354_v30 }
 0x246   : > { %v283_v37 = vpop.permute.xlu1 %282  ;;  %vm360_vm7 = vcmp.le.f32.partialorder %v356_v34, %v358_v35  ;;  %vm364_vm8 = vcmp.ge.f32.partialorder %v356_v34, %v362_v36  ;;  %671 = vrsqrt.f32 %v322_v33  ;;  %vm326_vm15 = vcmp.eq.f32.partialorder %v322_v33, inf }
 0x247   : > { %v287_v38 = vsub.f32 %v277_v31, %v283_v37  ;;  %v317_v39 = vsub.f32 %v315_v32, %v283_v37  ;;  %v366_v41 = vsel %vm364_vm8, 2, %v751_v40  ;;  %v329_v3 = vand.u32 2147483648, %v322_v33 }
 0x248   : > { %v368_v42 = vsel %vm360_vm7, 0, %v366_v41  ;;  %vm328_vm0 = vcmp.eq.f32.partialorder %v322_v33, 0.0 }
 0x249   : > { %v319_v43 = vmul.f32 %v287_v38, %v287_v38  ;;  %v321_v44 = vmul.f32 %v317_v39, %v317_v39  ;;  %v355_v45 = vand.u32 2147483647, %v287_v38  ;;  %v374_v46 = vsub.s32 0, %v368_v42 }
 0x24a   : > { %v378_v47 = vsub.s32 4, %v368_v42  ;;  %v616_v48 = vadd.s32 4294967292, %v368_v42  ;;  %v357_v50 = vand.u32 2147483647, %v317_v39  ;;  %vm373_vm13 = vcmp.ge.f32.partialorder %v317_v39, 0.0 }
 0x24b   : > { %v323_v49 = vadd.f32 %v321_v44, %v319_v43  ;;  %v359_v51 = vmul.f32 0.41421357, %v355_v45  ;;  %v363_v52 = vmul.f32 2.4142134, %v355_v45  ;;  %v376_v53 = vsel %vm372_vm9, %v368_v42, %v374_v46 }
 0x24c   : > { %v382_v54 = vsel %vm372_vm9, %v378_v47, %v616_v48  ;;  %vm371_vm14 = vcmp.ge.f32.partialorder %v287_v38, 0.0 }
 0x24d   : > { %v384_v55 = vsel %vm370_vm10, %v376_v53, %v382_v54  ;;  %vm361_vm11 = vcmp.le.f32.partialorder %v357_v50, %v359_v51  ;;  %vm365_vm12 = vcmp.ge.f32.partialorder %v357_v50, %v363_v52  ;;  %673 = vrsqrt.f32 %v323_v49 }
 0x24e   : > { %v367_v56 = vsel %vm365_vm12, 2, %v751_v40  ;;  %vm333_vm1 = vcmp.eq.f32.partialorder %v323_v49, inf  ;;  %v336_v8 = vand.u32 2147483648, %v323_v49  ;;  %vm335_vm3 = vcmp.eq.f32.partialorder %v323_v49, 0.0 }
 0x24f   : > { %v369_v57 = vsel %vm361_vm11, 0, %v367_v56  ;;  %v386_v24 = vadd.s32 4, %v384_v55 }
 0x250   : > { %v375_v58 = vsub.s32 0, %v369_v57  ;;  %v379_v59 = vsub.s32 4, %v369_v57  ;;  %v617_v60 = vadd.s32 4294967292, %v369_v57 }
 0x251   : > { %vm388_vm4 = vcmp.eq.s32.totalorder %v386_v24, 8 }
 0x252   : > { %v377_v61 = vsel %vm373_vm13, %v369_v57, %v375_v58  ;;  %v383_v62 = vsel %vm373_vm13, %v379_v59, %v617_v60  ;;  %v896_v28 = vsel %vm388_vm4, 0, %v386_v24 }
 0x253   : > { %v385_v63 = vsel %vm371_vm14, %v377_v61, %v383_v62  ;;  %v672_v1 = vpop.eup %671  ;;  %vm407_vm7 = vcmp.eq.s32.totalorder %v896_v28, 0  ;;  %vm421_vm8 = vcmp.eq.s32.totalorder %v896_v28, 4  ;;  %vm429_vm9 = vcmp.eq.s32.totalorder %v896_v28, 1 }
 0x254   : > { %v325_v2 = vmul.f32 %v672_v1, %v322_v33  ;;  %v387_v25 = vadd.s32 4, %v385_v63  ;;  %vm443_vm10 = vcmp.eq.s32.totalorder %v896_v28, 5  ;;  %vm467_vm11 = vcmp.eq.s32.totalorder %v896_v28, 3 }
 0x255   : > { %vm473_vm14 = vcmp.eq.s32.totalorder %v896_v28, 7 }
 0x256   : > { %v327_v4 = vsel %vm326_vm15, %v322_v33, %v325_v2  ;;  %vm389_vm5 = vcmp.eq.s32.totalorder %v387_v25, 8 }
 0x257   : > { %v330_v0 = vsel %vm328_vm0, %v329_v3, %v327_v4  ;;  %v898_v29 = vsel %vm389_vm5, 0, %v387_v25  ;;  %vm449_vm5 = vcmp.eq.s32.totalorder %v896_v28, 2 }
 0x258   : > { %v338_v6 = vsel %vm1021_vm2, %v330_v0, -inf  ;;  %vm408_vm12 = vcmp.eq.s32.totalorder %v898_v29, 0  ;;  %vm422_vm13 = vcmp.eq.s32.totalorder %v898_v29, 4  ;;  %vm444_vm15 = vcmp.eq.s32.totalorder %v898_v29, 5 }
 0x259   : > { %339 = vmax.xlane.f32.xlu0 %v338_v6  ;;  %vm468_vm0 = vcmp.eq.s32.totalorder %v898_v29, 3  ;;  %vm462_vm4 = vcmp.eq.s32.totalorder %v898_v29, 6 }
 0x25a   : > { %v674_v5 = vpop.eup %673 }
 0x25b   : > { %v332_v7 = vmul.f32 %v674_v5, %v323_v49 }
 0x25d   : > { %v334_v9 = vsel %vm333_vm1, %v323_v49, %v332_v7  ;;  %vm474_vm1 = vcmp.eq.s32.totalorder %v898_v29, 7 }
 0x25e   : > { %v337_v10 = vsel %vm335_vm3, %v336_v8, %v334_v9  ;;  %vm450_vm3 = vcmp.eq.s32.totalorder %v898_v29, 2 }
 0x25f   : > { %v341_v11 = vsel %vm1021_vm2, %v337_v10, -inf  ;;  %vm461_vm2 = vcmp.eq.s32.totalorder %v896_v28, 6 }
 0x260   : > { %342 = vmax.xlane.f32.xlu1 %v341_v11 }
 0x2e2   : > { %v340_v12 = vpop.xlane.xlu0 %339 }
 0x2e9   : > { %v343_v13 = vpop.xlane.xlu1 %342 }
 0x2ea   : > { %v344_v14 = vmax.f32 %v340_v12, %v343_v13 }
 0x2ec   : > { %v345_v15 = vrot.slane %v344_v14, 4 }
 0x2ee   : > { %v346_v16 = vmax.f32 %v344_v14, %v345_v15 }
 0x2f0   : > { %v347_v17 = vrot.slane %v346_v16, 2 }
 0x2f2   : > { %v348_v18 = vmax.f32 %v346_v16, %v347_v17 }
 0x2f4   : > { %v349_v19 = vrot.slane %v348_v18, 1 }
 0x2f6   : > { %v350_v20 = vmax.f32 %v348_v18, %v349_v19 }
 0x2f8   : > { %675 = vrcp.f32 %v350_v20 }
 0x305   : > { %v676_v21 = vpop.eup %675 }
 0x306   : > { %v886_v22 = vmul.f32 %v676_v21, %v337_v10  ;;  %v888_v23 = vmul.f32 %v676_v21, %v330_v0 }
 0x308   : > { %399 = vrot.lane.b32.xlu1 %v886_v22, %s750_s23  ;;  %397 = vrot.lane.b32.xlu0 %v888_v23, %s750_s23 }
 0x37a   : > { %v400_v26 = vpop.permute.xlu1 %399  ;;  %v398_v27 = vpop.permute.xlu0 %397 }
 0x37b   : > { %404 = vst.msk [vmem:[#allocation4 + $0x9] sm:$0xff] %vm243_vm6, %v400_v26  ;;  %403 = vst.msk [vmem:[#allocation4 + $0x1] sm:$0xff] %vm243_vm6, %v398_v27  ;;  %vm430_vm6 = vcmp.eq.s32.totalorder %v898_v29, 1 }
 0x382   : > { %v406_v30 = vld [vmem:[#allocation4 + $0x9] sm:$0xff]  ;;  %v405_v31 = vld [vmem:[#allocation4 + $0x1] sm:$0xff] }
 0x383   : > { %v428_v32 = vld [vmem:[#allocation4 + $0xa] sm:$0xff]  ;;  %413 = vrot.lane.b32.xlu1 %v406_v30, %s746_s15  ;;  %411 = vrot.lane.b32.xlu0 %v405_v31, %s746_s15  ;;  %v427_v33 = vld [vmem:[#allocation4 + $0x2] sm:$0xff]  ;;  %v480_v36 = vsel %vm422_vm13, %v406_v30, 0.0  ;;  %v484_v37 = vsel %vm408_vm12, %v406_v30, 0.0  ;;  %v479_v38 = vsel %vm421_vm8, %v405_v31, 0.0  ;;  %v483_v39 = vsel %vm407_vm7, %v405_v31, 0.0 }
 0x384   : > { %v488_v34 = vld [vmem:[#allocation4 + $0x8] sm:$0xff]  ;;  %v487_v35 = vld [vmem:[#allocation4] sm:$0xff]  ;;  %v470_v44 = vsel %vm468_vm0, %v428_v32, 0.0  ;;  %v476_v45 = vsel %vm474_vm1, %v428_v32, 0.0  ;;  %v469_v46 = vsel %vm467_vm11, %v427_v33, 0.0  ;;  %v475_v47 = vsel %vm473_vm14, %v427_v33, 0.0 }
 0x385   : > { %v490_v40 = vsel %vm444_vm15, %v488_v34, 0.0  ;;  %v494_v41 = vsel %vm430_vm6, %v488_v34, 0.0  ;;  %v489_v42 = vsel %vm443_vm10, %v487_v35, 0.0  ;;  %v493_v43 = vsel %vm429_vm9, %v487_v35, 0.0 }
 0x387   : > { %435 = vrot.lane.b32.xlu1 %v428_v32, %s746_s15  ;;  %433 = vrot.lane.b32.xlu0 %v427_v33, %s746_s15 }
 0x38b   : > { %453 = vrot.lane.b32.xlu1 %v428_v32, %s749_s22  ;;  %451 = vrot.lane.b32.xlu0 %v427_v33, %s749_s22 }
 0x38f   : > { %501 = vrot.lane.b32.xlu1 %v488_v34, %s749_s22  ;;  %499 = vrot.lane.b32.xlu0 %v487_v35, %s749_s22 }
 0x393   : > { %515 = vrot.lane.b32.xlu1 %v488_v34, %s746_s15  ;;  %513 = vrot.lane.b32.xlu0 %v487_v35, %s746_s15 }
 0x3f5   : > { %v414_v48 = vpop.permute.xlu1 %413  ;;  %v412_v49 = vpop.permute.xlu0 %411 }
 0x3f6   : > { %v418_v56 = vsel %vm408_vm12, %v414_v48, 0.0  ;;  %v424_v57 = vsel %vm422_vm13, %v414_v48, 0.0  ;;  %v417_v58 = vsel %vm407_vm7, %v412_v49, 0.0  ;;  %v423_v59 = vsel %vm421_vm8, %v412_v49, 0.0 }
 0x3f7   : > { %vm1026_vm8 = vcmask 130048  }
 0x3f9   : > { %v436_v50 = vpop.permute.xlu1 %435  ;;  %v434_v51 = vpop.permute.xlu0 %433 }
 0x3fa   : > { %v440_v52 = vsel %vm430_vm6, %v436_v50, 0.0  ;;  %v446_v53 = vsel %vm444_vm15, %v436_v50, 0.0  ;;  %v439_v54 = vsel %vm429_vm9, %v434_v51, 0.0  ;;  %v445_v55 = vsel %vm443_vm10, %v434_v51, 0.0  ;;  %vm1027_vm9 = vmmov %vm1026_vm8 }
 0x3fb   : > { %v442_v60 = vadd.f32 %v440_v52, %v418_v56  ;;  %v448_v61 = vadd.f32 %v446_v53, %v424_v57  ;;  %v441_v62 = vadd.f32 %v439_v54, %v417_v58  ;;  %v447_v63 = vadd.f32 %v445_v55, %v423_v59 }
 0x3fd   : > { %v454_v1 = vpop.permute.xlu1 %453  ;;  %v452_v2 = vpop.permute.xlu0 %451 }
 0x3fe   : > { %v458_v3 = vsel %vm450_vm3, %v454_v1, 0.0  ;;  %v464_v4 = vsel %vm462_vm4, %v454_v1, 0.0  ;;  %v457_v0 = vsel %vm449_vm5, %v452_v2, 0.0  ;;  %v463_v5 = vsel %vm461_vm2, %v452_v2, 0.0 }
 0x3ff   : > { %v460_v6 = vadd.f32 %v458_v3, %v442_v60  ;;  %v466_v7 = vadd.f32 %v464_v4, %v448_v61  ;;  %v459_v8 = vadd.f32 %v457_v0, %v441_v62  ;;  %v465_v9 = vadd.f32 %v463_v5, %v447_v63 }
 0x401   : > { %v502_v10 = vpop.permute.xlu1 %501  ;;  %v500_v11 = vpop.permute.xlu0 %499  ;;  %v472_v12 = vadd.f32 %v470_v44, %v460_v6  ;;  %v478_v13 = vadd.f32 %v476_v45, %v466_v7  ;;  %v471_v14 = vadd.f32 %v469_v46, %v459_v8  ;;  %v477_v15 = vadd.f32 %v475_v47, %v465_v9 }
 0x402   : > { %v506_v30 = vsel %vm462_vm4, %v502_v10, 0.0  ;;  %v510_v31 = vsel %vm450_vm3, %v502_v10, 0.0  ;;  %v505_v32 = vsel %vm461_vm2, %v500_v11, 0.0  ;;  %v509_v33 = vsel %vm449_vm5, %v500_v11, 0.0 }
 0x403   : > { %v482_v16 = vadd.f32 %v480_v36, %v472_v12  ;;  %v486_v17 = vadd.f32 %v484_v37, %v478_v13  ;;  %v481_v18 = vadd.f32 %v479_v38, %v471_v14  ;;  %v485_v19 = vadd.f32 %v483_v39, %v477_v15 }
 0x405   : > { %v516_v20 = vpop.permute.xlu1 %515  ;;  %v492_v21 = vadd.f32 %v490_v40, %v482_v16  ;;  %v496_v24 = vadd.f32 %v494_v41, %v486_v17  ;;  %v514_v25 = vpop.permute.xlu0 %513  ;;  %v491_v26 = vadd.f32 %v489_v42, %v481_v18  ;;  %v495_v27 = vadd.f32 %v493_v43, %v485_v19 }
 0x406   : > { %v520_v38 = vsel %vm474_vm1, %v516_v20, 0.0  ;;  %v524_v39 = vsel %vm468_vm0, %v516_v20, 0.0  ;;  %v519_v40 = vsel %vm473_vm14, %v514_v25, 0.0  ;;  %v523_v41 = vsel %vm467_vm11, %v514_v25, 0.0 }
 0x407   : > { %v508_v34 = vadd.f32 %v506_v30, %v492_v21  ;;  %v512_v35 = vadd.f32 %v510_v31, %v496_v24  ;;  %v507_v36 = vadd.f32 %v505_v32, %v491_v26  ;;  %v511_v37 = vadd.f32 %v509_v33, %v495_v27 }
 0x409   : > { %v522_v42 = vadd.f32 %v520_v38, %v508_v34  ;;  %v526_v43 = vadd.f32 %v524_v39, %v512_v35  ;;  %v521_v44 = vadd.f32 %v519_v40, %v507_v36  ;;  %v525_v45 = vadd.f32 %v523_v41, %v511_v37 }
 0x40b   : > { %v528_v46 = vsub.f32 %v886_v22, %v522_v42  ;;  %v530_v47 = vsub.f32 %v886_v22, %v526_v43  ;;  %v527_v48 = vsub.f32 %v888_v23, %v521_v44  ;;  %v529_v29 = vsub.f32 %v888_v23, %v525_v45 }
 0x40d   : > { %v532_v49 = vmin.f32 %v528_v46, %v530_v47  ;;  %v531_v50 = vmin.f32 %v527_v48, %v529_v29 }
 0x40f   : > { %vm534_vm2 = vcmp.gt.f32.partialorder %v532_v49, 0.0  ;;  %vm533_vm7 = vcmp.gt.f32.partialorder %v531_v50, 0.0 }
 0x410   : > { %v536_v28 = vsel %vm534_vm2, %v886_v22, 0.0  ;;  %v535_v51 = vsel %vm533_vm7, %v888_v23, 0.0 }
 0x411   : > { %538 = vst.msk [vmem:[%s136_s27 + $0x8] sm:$0xff] %vm1026_vm8, %v536_v28 }
 0x412   : > { %537 = vst.msk [vmem:[%s136_s27] sm:$0xff] %vm1027_vm9, %v535_v51 }
 0x413 PF: > { %p11_p9 = scmp.ge.s32.totalorder %s784_s11, 4   ;;  %s1028_s6 = smov %s731_s7 }
 0x414   : > { %s1029_s7 = smov %s735_s8  ;;  %s1030_s8 = smov %s794_s14 }
 0x415   : > { %s1031_s9 = smov %s784_s11  ;;  %13 = sbr.rel (!%p11_p9) target bundleno = 3 (0x3), region = 64 }
 0x41a   :  { %560 = vsyncpa [#allocation6], 1 }
 0x41b   :  { %562 = vsyncpa [#allocation6 + $0x1], 1 }

</bundles_post_ra>
